<compile_context>
chip_gen: v7x
topology: tpu7x:2x2x1
jax: 0.10.0
libtpu: 0.0.40
codegen_flags: <defaults>
</compile_context>

<pallas_src>
import functools

import jax
import jax.numpy as jnp
from jax.experimental import pallas as pl
from jax.experimental.pallas import tpu as pltpu

jax.config.update("jax_default_matmul_precision", "highest")

# ---- model hyper-parameters (small, consistent with the module) -------------
VOCAB = 16          # input_size (embedding rows / token ids)
HIDDEN = 32         # hidden_size
OUTPUT = 16         # output_size
NUM_LAYERS = 2      # the wavefront kernel is specialized to 2 LSTM layers
BATCH = 2
SEQ = 8

GATES = 4 * HIDDEN  # 128 -> one lane-dense vreg of gates per layer


def _round8(x):
    return -(-x // 8) * 8


# ---- packed-slab row layout (shared by pack_params / kernel / wrapper) -------
R_EMB = 2 * HIDDEN                      # weight slab: fused (E @ Wih0^T) block
R_BIAS = _round8(R_EMB + VOCAB)         # weight slab: [b0 | b1] row
R_FC = _round8(R_BIAS + 1)              # weight slab: fc_w^T (zero-padded to 128 lanes)
R_FCB = R_FC + HIDDEN                   # weight slab: fc_b row
W_ROWS = _round8(R_FCB + 1)             # 128
W_COLS = 2 * GATES                      # 256

R_STATE = _round8(SEQ * BATCH)          # input slab: initial [h0|h1|c0|c1] rows
IN_ROWS = _round8(R_STATE + BATCH)      # 24
IN_COLS = GATES                         # 128

OUT_ROWS = 8                            # output slab: rows 0:B state, rows B:2B logits
OUT_COLS = GATES                        # 128


# --------------------------- fused forward kernel ----------------------------
def fused_music_rnn_kernel(in_ref, w_ref, out_ref, *, seq, batch, hidden, vocab):
    """Embedding + 2-layer LSTM wavefront + final-step FC, single invocation (no grid)."""
    S, B, H, V = seq, batch, hidden, vocab
    G = 4 * H
    hi = jax.lax.Precision.HIGHEST

    # ---- static slices of the packed slabs (hoisted, loaded once) -----------
    w_wave = w_ref[0:2 * H, :]                       # (2H, 2G): [[Whh0^T,Wih1^T],[0,Whh1^T]]
    w_emb0 = w_ref[R_EMB:R_EMB + V, 0:G]             # (V, G):  E @ Wih0^T  (emb fused w/ L0 input proj)
    b0 = w_ref[R_BIAS:R_BIAS + 1, 0:G]               # (1, G)
    b1 = w_ref[R_BIAS:R_BIAS + 1, G:2 * G]           # (1, G)

    onehot = in_ref[0:S * B, 0:V]                    # (S*B, V) time-major one-hot tokens
    h0 = in_ref[R_STATE:R_STATE + B, 0 * H:1 * H]    # (B, H) layer-0 hidden
    h1 = in_ref[R_STATE:R_STATE + B, 1 * H:2 * H]    # (B, H) layer-1 hidden
    c0 = in_ref[R_STATE:R_STATE + B, 2 * H:3 * H]    # (B, H) layer-0 cell
    c1 = in_ref[R_STATE:R_STATE + B, 3 * H:4 * H]    # (B, H) layer-1 cell

    # Layer-0 input projection for ALL timesteps (embedding lookup folded in):
    # one MXU call, hoisted off the serial chain.
    gx0 = jnp.dot(onehot, w_emb0, precision=hi,
                  preferred_element_type=jnp.float32) + b0                 # (S*B, G)

    def lstm_cell(gates, c_prev):
        # Two full-width EUP ops on the (B,128) gates vreg, then static lane slices
        # for the i/f/g/o pieces (PyTorch gate order).
        sig = jax.nn.sigmoid(gates)
        th = jnp.tanh(gates)
        c_new = sig[:, H:2 * H] * c_prev + sig[:, 0:H] * th[:, 2 * H:3 * H]
        h_new = sig[:, 3 * H:4 * H] * jnp.tanh(c_new)
        return h_new, c_new

    # ---- (layer, time) wavefront: S+1 serial steps instead of 2*S -----------
    for w in range(S + 1):                           # static unroll (SEQ=8 -> 9 steps)
        lhs = jnp.concatenate([h0, h1], axis=1)      # (B, 2H)
        comb = jnp.dot(lhs, w_wave, precision=hi,
                       preferred_element_type=jnp.float32)                 # (B, 2G)
        h0_next, c0_next = h0, c0
        if w < S:                                    # layer 0 processes time t = w
            h0_next, c0_next = lstm_cell(gx0[w * B:(w + 1) * B, :] + comb[:, 0:G], c0)
        if w >= 1:                                   # layer 1 processes time t = w - 1
            h1, c1 = lstm_cell(comb[:, G:2 * G] + b1, c1)
        h0, c0 = h0_next, c0_next

    # ---- final FC on the top layer's last hidden (lane-dense, zero-padded) --
    fc_w = w_ref[R_FC:R_FC + H, 0:G]                 # (H, 128): fc_w^T padded to 128 lanes
    fc_b = w_ref[R_FCB:R_FCB + 1, 0:G]               # (1, 128)
    logits = jnp.dot(h1, fc_w, precision=hi,
                     preferred_element_type=jnp.float32) + fc_b            # (B, 128)

    state = jnp.concatenate([h0, h1, c0, c1], axis=1)                      # (B, 128)
    pad = jnp.zeros((OUT_ROWS - 2 * B, G), jnp.float32)
    out_ref[...] = jnp.concatenate([state, logits, pad], axis=0)           # one unmasked (8,128) store


def music_rnn_forward(packed, x_tokens, hidden):
    """x_tokens: (B, S) int32; hidden: (h0, c0) each (L, B, H). Returns (out, (hN, cN))."""
    h_init, c_init = hidden
    B, S = x_tokens.shape
    L, _, H = h_init.shape
    V, O = VOCAB, OUTPUT

    # Per-call input slab: time-major one-hot tokens + packed initial state (lane-dense).
    # TODO(synk): out-of-range token ids yield an all-zero embedding row here (nn.Embedding
    # would raise); valid ids in [0, VOCAB) behave identically.
    ids = jnp.transpose(x_tokens).reshape(S * B).astype(jnp.int32)
    onehot = (ids[:, None] == jnp.arange(V, dtype=jnp.int32)[None, :]).astype(jnp.float32)
    state0 = jnp.concatenate([h_init[0], h_init[1], c_init[0], c_init[1]], axis=1)   # (B, 4H)
    in_slab = jnp.zeros((IN_ROWS, IN_COLS), jnp.float32)
    in_slab = in_slab.at[0:S * B, 0:V].set(onehot)
    in_slab = in_slab.at[R_STATE:R_STATE + B, :].set(state0)

    kernel = functools.partial(fused_music_rnn_kernel, seq=S, batch=B, hidden=H, vocab=V)
    vmem = functools.partial(pl.BlockSpec, memory_space=pltpu.MemorySpace.VMEM)

    out_slab = pl.pallas_call(
        kernel,
        out_shape=jax.ShapeDtypeStruct((OUT_ROWS, OUT_COLS), jnp.float32),
        in_specs=[vmem(), vmem()],          # two whole-array VMEM-resident slabs
        out_specs=vmem(),
    )(in_slab, packed["w_slab"])

    hn = jnp.stack([out_slab[0:B, 0:H], out_slab[0:B, H:2 * H]])
    cn = jnp.stack([out_slab[0:B, 2 * H:3 * H], out_slab[0:B, 3 * H:4 * H]])
    out = out_slab[B:2 * B, 0:O]
    return out, (hn, cn)


# -------------------- param init (PyTorch layout) + packing -------------------
def init_params(key):
    bound = 1.0 / jnp.sqrt(HIDDEN)
    ks = jax.random.split(key, 3 + 4 * NUM_LAYERS)
    p = {
        "embedding": jax.random.normal(ks[0], (VOCAB, HIDDEN), jnp.float32),
        "fc_w": jax.random.uniform(ks[1], (OUTPUT, HIDDEN), jnp.float32, -bound, bound),
        "fc_b": jax.random.uniform(ks[2], (OUTPUT,), jnp.float32, -bound, bound),
        "wih": [], "whh": [], "bih": [], "bhh": [],
    }
    for l in range(NUM_LAYERS):
        k0, k1, k2, k3 = ks[3 + 4 * l: 7 + 4 * l]
        p["wih"].append(jax.random.uniform(k0, (4 * HIDDEN, HIDDEN), jnp.float32, -bound, bound))
        p["whh"].append(jax.random.uniform(k1, (4 * HIDDEN, HIDDEN), jnp.float32, -bound, bound))
        p["bih"].append(jax.random.uniform(k2, (4 * HIDDEN,), jnp.float32, -bound, bound))
        p["bhh"].append(jax.random.uniform(k3, (4 * HIDDEN,), jnp.float32, -bound, bound))
    return p


def pack_params(raw):
    """One-time pre-transpose / pre-fuse of all weights into a single lane-dense VMEM slab."""
    assert NUM_LAYERS == 2, "wavefront kernel is specialized to 2 LSTM layers"
    H, V, O, G = HIDDEN, VOCAB, OUTPUT, GATES
    f32 = jnp.float32
    whh0_t = raw["whh"][0].T.astype(f32)                               # (H, G)
    wih1_t = raw["wih"][1].T.astype(f32)                               # (H, G)
    whh1_t = raw["whh"][1].T.astype(f32)                               # (H, G)
    w_wave = jnp.concatenate(
        [jnp.concatenate([whh0_t, wih1_t], axis=1),
         jnp.concatenate([jnp.zeros((H, G), f32), whh1_t], axis=1)], axis=0)   # (2H, 2G)
    w_emb0 = raw["embedding"] @ raw["wih"][0].T                        # (V, G): emb fused w/ L0 input proj
    b0 = raw["bih"][0] + raw["bhh"][0]                                 # (G,)
    b1 = raw["bih"][1] + raw["bhh"][1]                                 # (G,)

    slab = jnp.zeros((W_ROWS, W_COLS), f32)
    slab = slab.at[0:2 * H, :].set(w_wave)
    slab = slab.at[R_EMB:R_EMB + V, 0:G].set(w_emb0)
    slab = slab.at[R_BIAS, 0:G].set(b0)
    slab = slab.at[R_BIAS, G:2 * G].set(b1)
    slab = slab.at[R_FC:R_FC + H, 0:O].set(raw["fc_w"].T)              # zero-padded to 128 lanes
    slab = slab.at[R_FCB, 0:O].set(raw["fc_b"])
    return {"w_slab": slab}


# ------------------------- pure-JAX reference (check) ------------------------
def ref_forward(params, x_tokens, hidden):
    h_all, c_all = hidden
    x = jnp.take(params["embedding"], x_tokens, axis=0)               # (B, S, H)
    hs, cs = [], []
    for l in range(NUM_LAYERS):
        wih, whh = params["wih"][l], params["whh"][l]
        b = params["bih"][l] + params["bhh"][l]

        def step(carry, xt, wih=wih, whh=whh, b=b):
            hp, cp = carry
            g = xt @ wih.T + hp @ whh.T + b
            i, f, gg, o = jnp.split(g, 4, axis=-1)
            i, f, o = jax.nn.sigmoid(i), jax.nn.sigmoid(f), jax.nn.sigmoid(o)
            gg = jnp.tanh(gg)
            cn = f * cp + i * gg
            hn = o * jnp.tanh(cn)
            return (hn, cn), hn

        (hf, cf), ys = jax.lax.scan(step, (h_all[l], c_all[l]),
                                    jnp.transpose(x, (1, 0, 2)))
        x = jnp.transpose(ys, (1, 0, 2))
        hs.append(hf)
        cs.append(cf)
    out = x[:, -1, :] @ params["fc_w"].T + params["fc_b"]
    return out, (jnp.stack(hs), jnp.stack(cs))


if __name__ == "__main__":
    key = jax.random.PRNGKey(0)
    pkey, xkey, hkey, ckey = jax.random.split(key, 4)
    raw_params = init_params(pkey)
    packed_params = pack_params(raw_params)

    x_tokens = jax.random.randint(xkey, (BATCH, SEQ), 0, VOCAB, dtype=jnp.int32)
    # Non-zero initial hidden to exercise the h0/c0 paths (init_hidden() zeros also work).
    hidden = (0.1 * jax.random.normal(hkey, (NUM_LAYERS, BATCH, HIDDEN), jnp.float32),
              0.1 * jax.random.normal(ckey, (NUM_LAYERS, BATCH, HIDDEN), jnp.float32))

    fwd = jax.jit(music_rnn_forward)
    out, (hn, cn) = fwd(packed_params, x_tokens, hidden)
    out = jax.block_until_ready(out)
    hn = jax.block_until_ready(hn)
    cn = jax.block_until_ready(cn)

    ref_out, (ref_hn, ref_cn) = ref_forward(raw_params, x_tokens, hidden)
    assert out.shape == (BATCH, OUTPUT)
    assert hn.shape == (NUM_LAYERS, BATCH, HIDDEN) and cn.shape == (NUM_LAYERS, BATCH, HIDDEN)
    assert jnp.allclose(out, ref_out, atol=1e-4, rtol=1e-4)
    assert jnp.allclose(hn, ref_hn, atol=1e-4, rtol=1e-4)
    assert jnp.allclose(cn, ref_cn, atol=1e-4, rtol=1e-4)

    print("KERNEL_OK")
</pallas_src>

<mosaic_0001>
module attributes {stable_mosaic.version = 11 : i64} {
  func.func @fused_music_rnn_kernel(%arg0: memref<24x128xf32, #tpu.memory_space<vmem>>, %arg1: memref<128x256xf32, #tpu.memory_space<vmem>>, %arg2: memref<8x128xf32, #tpu.memory_space<vmem>>) attributes {dimension_semantics = [], scalar_prefetch = 0 : i64, scratch_operands = 0 : i64, tpu.core_type = #tpu.core_type<tc>} {
    %c0 = arith.constant 0 : index
    %c0_0 = arith.constant 0 : index
    %0 = vector.load %arg1[%c0, %c0_0] : memref<128x256xf32, #tpu.memory_space<vmem>>, vector<64x256xf32>
    %c64 = arith.constant 64 : index
    %c0_1 = arith.constant 0 : index
    %1 = vector.load %arg1[%c64, %c0_1] : memref<128x256xf32, #tpu.memory_space<vmem>>, vector<16x128xf32>
    %c80 = arith.constant 80 : index
    %c0_2 = arith.constant 0 : index
    %2 = vector.load %arg1[%c80, %c0_2] : memref<128x256xf32, #tpu.memory_space<vmem>>, vector<1x128xf32>
    %c80_3 = arith.constant 80 : index
    %c128 = arith.constant 128 : index
    %3 = vector.load %arg1[%c80_3, %c128] : memref<128x256xf32, #tpu.memory_space<vmem>>, vector<1x128xf32>
    %c0_4 = arith.constant 0 : index
    %c0_5 = arith.constant 0 : index
    %4 = vector.load %arg0[%c0_4, %c0_5] : memref<24x128xf32, #tpu.memory_space<vmem>>, vector<16x16xf32>
    %c16 = arith.constant 16 : index
    %c0_6 = arith.constant 0 : index
    %5 = vector.load %arg0[%c16, %c0_6] : memref<24x128xf32, #tpu.memory_space<vmem>>, vector<2x32xf32>
    %c16_7 = arith.constant 16 : index
    %c32 = arith.constant 32 : index
    %6 = vector.load %arg0[%c16_7, %c32] : memref<24x128xf32, #tpu.memory_space<vmem>>, vector<2x32xf32>
    %c16_8 = arith.constant 16 : index
    %c64_9 = arith.constant 64 : index
    %7 = vector.load %arg0[%c16_8, %c64_9] : memref<24x128xf32, #tpu.memory_space<vmem>>, vector<2x32xf32>
    %c16_10 = arith.constant 16 : index
    %c96 = arith.constant 96 : index
    %8 = vector.load %arg0[%c16_10, %c96] : memref<24x128xf32, #tpu.memory_space<vmem>>, vector<2x32xf32>
    %cst = arith.constant dense<0.000000e+00> : vector<16x128xf32>
    %9 = tpu.matmul %4, %1, %cst {dimension_numbers = #tpu.dot_dimension_numbers<[1], [0], [0], [1], [0, 0, 1, 1], [], []>, precision = #tpu.contract_precision<fp32>} : vector<16x16xf32>, vector<16x128xf32>, vector<16x128xf32> -> vector<16x128xf32>
    %10 = vector.broadcast %2 : vector<1x128xf32> to vector<16x128xf32>
    %11 = arith.addf %9, %10 : vector<16x128xf32>
    %12 = tpu.concatenate %5, %6 in 1 : vector<2x32xf32>, vector<2x32xf32> -> vector<2x64xf32>
    %cst_11 = arith.constant dense<0.000000e+00> : vector<2x256xf32>
    %13 = tpu.matmul %12, %0, %cst_11 {dimension_numbers = #tpu.dot_dimension_numbers<[1], [0], [0], [1], [0, 0, 1, 1], [], []>, precision = #tpu.contract_precision<fp32>} : vector<2x64xf32>, vector<64x256xf32>, vector<2x256xf32> -> vector<2x256xf32>
    %14 = vector.extract_strided_slice %11 {offsets = [0, 0], sizes = [2, 128], strides = [1, 1]} : vector<16x128xf32> to vector<2x128xf32>
    %15 = vector.extract_strided_slice %13 {offsets = [0, 0], sizes = [2, 128], strides = [1, 1]} : vector<2x256xf32> to vector<2x128xf32>
    %16 = arith.addf %14, %15 : vector<2x128xf32>
    %17 = arith.negf %16 : vector<2x128xf32>
    %18 = math.exp %17 : vector<2x128xf32>
    %cst_12 = arith.constant 1.000000e+00 : f32
    %19 = vector.broadcast %cst_12 : f32 to vector<2x128xf32>
    %20 = arith.addf %19, %18 : vector<2x128xf32>
    %21 = arith.divf %19, %20 : vector<2x128xf32>
    %22 = math.tanh %16 : vector<2x128xf32>
    %23 = vector.extract_strided_slice %21 {offsets = [0, 32], sizes = [2, 32], strides = [1, 1]} : vector<2x128xf32> to vector<2x32xf32>
    %24 = arith.mulf %23, %7 : vector<2x32xf32>
    %25 = vector.extract_strided_slice %21 {offsets = [0, 0], sizes = [2, 32], strides = [1, 1]} : vector<2x128xf32> to vector<2x32xf32>
    %26 = vector.extract_strided_slice %22 {offsets = [0, 64], sizes = [2, 32], strides = [1, 1]} : vector<2x128xf32> to vector<2x32xf32>
    %27 = arith.mulf %25, %26 : vector<2x32xf32>
    %28 = arith.addf %24, %27 : vector<2x32xf32>
    %29 = vector.extract_strided_slice %21 {offsets = [0, 96], sizes = [2, 32], strides = [1, 1]} : vector<2x128xf32> to vector<2x32xf32>
    %30 = math.tanh %28 : vector<2x32xf32>
    %31 = arith.mulf %29, %30 : vector<2x32xf32>
    %32 = tpu.concatenate %31, %6 in 1 : vector<2x32xf32>, vector<2x32xf32> -> vector<2x64xf32>
    %cst_13 = arith.constant dense<0.000000e+00> : vector<2x256xf32>
    %33 = tpu.matmul %32, %0, %cst_13 {dimension_numbers = #tpu.dot_dimension_numbers<[1], [0], [0], [1], [0, 0, 1, 1], [], []>, precision = #tpu.contract_precision<fp32>} : vector<2x64xf32>, vector<64x256xf32>, vector<2x256xf32> -> vector<2x256xf32>
    %34 = vector.extract_strided_slice %11 {offsets = [2, 0], sizes = [2, 128], strides = [1, 1]} : vector<16x128xf32> to vector<2x128xf32>
    %35 = vector.extract_strided_slice %33 {offsets = [0, 0], sizes = [2, 128], strides = [1, 1]} : vector<2x256xf32> to vector<2x128xf32>
    %36 = arith.addf %34, %35 : vector<2x128xf32>
    %37 = arith.negf %36 : vector<2x128xf32>
    %38 = math.exp %37 : vector<2x128xf32>
    %cst_14 = arith.constant 1.000000e+00 : f32
    %39 = vector.broadcast %cst_14 : f32 to vector<2x128xf32>
    %40 = arith.addf %39, %38 : vector<2x128xf32>
    %41 = arith.divf %39, %40 : vector<2x128xf32>
    %42 = math.tanh %36 : vector<2x128xf32>
    %43 = vector.extract_strided_slice %41 {offsets = [0, 32], sizes = [2, 32], strides = [1, 1]} : vector<2x128xf32> to vector<2x32xf32>
    %44 = arith.mulf %43, %28 : vector<2x32xf32>
    %45 = vector.extract_strided_slice %41 {offsets = [0, 0], sizes = [2, 32], strides = [1, 1]} : vector<2x128xf32> to vector<2x32xf32>
    %46 = vector.extract_strided_slice %42 {offsets = [0, 64], sizes = [2, 32], strides = [1, 1]} : vector<2x128xf32> to vector<2x32xf32>
    %47 = arith.mulf %45, %46 : vector<2x32xf32>
    %48 = arith.addf %44, %47 : vector<2x32xf32>
    %49 = vector.extract_strided_slice %41 {offsets = [0, 96], sizes = [2, 32], strides = [1, 1]} : vector<2x128xf32> to vector<2x32xf32>
    %50 = math.tanh %48 : vector<2x32xf32>
    %51 = arith.mulf %49, %50 : vector<2x32xf32>
    %52 = vector.extract_strided_slice %33 {offsets = [0, 128], sizes = [2, 128], strides = [1, 1]} : vector<2x256xf32> to vector<2x128xf32>
    %53 = vector.broadcast %3 : vector<1x128xf32> to vector<2x128xf32>
    %54 = arith.addf %52, %53 : vector<2x128xf32>
    %55 = arith.negf %54 : vector<2x128xf32>
    %56 = math.exp %55 : vector<2x128xf32>
    %cst_15 = arith.constant 1.000000e+00 : f32
    %57 = vector.broadcast %cst_15 : f32 to vector<2x128xf32>
    %58 = arith.addf %57, %56 : vector<2x128xf32>
    %59 = arith.divf %57, %58 : vector<2x128xf32>
    %60 = math.tanh %54 : vector<2x128xf32>
    %61 = vector.extract_strided_slice %59 {offsets = [0, 32], sizes = [2, 32], strides = [1, 1]} : vector<2x128xf32> to vector<2x32xf32>
    %62 = arith.mulf %61, %8 : vector<2x32xf32>
    %63 = vector.extract_strided_slice %59 {offsets = [0, 0], sizes = [2, 32], strides = [1, 1]} : vector<2x128xf32> to vector<2x32xf32>
    %64 = vector.extract_strided_slice %60 {offsets = [0, 64], sizes = [2, 32], strides = [1, 1]} : vector<2x128xf32> to vector<2x32xf32>
    %65 = arith.mulf %63, %64 : vector<2x32xf32>
    %66 = arith.addf %62, %65 : vector<2x32xf32>
    %67 = vector.extract_strided_slice %59 {offsets = [0, 96], sizes = [2, 32], strides = [1, 1]} : vector<2x128xf32> to vector<2x32xf32>
    %68 = math.tanh %66 : vector<2x32xf32>
    %69 = arith.mulf %67, %68 : vector<2x32xf32>
    %70 = tpu.concatenate %51, %69 in 1 : vector<2x32xf32>, vector<2x32xf32> -> vector<2x64xf32>
    %cst_16 = arith.constant dense<0.000000e+00> : vector<2x256xf32>
    %71 = tpu.matmul %70, %0, %cst_16 {dimension_numbers = #tpu.dot_dimension_numbers<[1], [0], [0], [1], [0, 0, 1, 1], [], []>, precision = #tpu.contract_precision<fp32>} : vector<2x64xf32>, vector<64x256xf32>, vector<2x256xf32> -> vector<2x256xf32>
    %72 = vector.extract_strided_slice %11 {offsets = [4, 0], sizes = [2, 128], strides = [1, 1]} : vector<16x128xf32> to vector<2x128xf32>
    %73 = vector.extract_strided_slice %71 {offsets = [0, 0], sizes = [2, 128], strides = [1, 1]} : vector<2x256xf32> to vector<2x128xf32>
    %74 = arith.addf %72, %73 : vector<2x128xf32>
    %75 = arith.negf %74 : vector<2x128xf32>
    %76 = math.exp %75 : vector<2x128xf32>
    %cst_17 = arith.constant 1.000000e+00 : f32
    %77 = vector.broadcast %cst_17 : f32 to vector<2x128xf32>
    %78 = arith.addf %77, %76 : vector<2x128xf32>
    %79 = arith.divf %77, %78 : vector<2x128xf32>
    %80 = math.tanh %74 : vector<2x128xf32>
    %81 = vector.extract_strided_slice %79 {offsets = [0, 32], sizes = [2, 32], strides = [1, 1]} : vector<2x128xf32> to vector<2x32xf32>
    %82 = arith.mulf %81, %48 : vector<2x32xf32>
    %83 = vector.extract_strided_slice %79 {offsets = [0, 0], sizes = [2, 32], strides = [1, 1]} : vector<2x128xf32> to vector<2x32xf32>
    %84 = vector.extract_strided_slice %80 {offsets = [0, 64], sizes = [2, 32], strides = [1, 1]} : vector<2x128xf32> to vector<2x32xf32>
    %85 = arith.mulf %83, %84 : vector<2x32xf32>
    %86 = arith.addf %82, %85 : vector<2x32xf32>
    %87 = vector.extract_strided_slice %79 {offsets = [0, 96], sizes = [2, 32], strides = [1, 1]} : vector<2x128xf32> to vector<2x32xf32>
    %88 = math.tanh %86 : vector<2x32xf32>
    %89 = arith.mulf %87, %88 : vector<2x32xf32>
    %90 = vector.extract_strided_slice %71 {offsets = [0, 128], sizes = [2, 128], strides = [1, 1]} : vector<2x256xf32> to vector<2x128xf32>
    %91 = vector.broadcast %3 : vector<1x128xf32> to vector<2x128xf32>
    %92 = arith.addf %90, %91 : vector<2x128xf32>
    %93 = arith.negf %92 : vector<2x128xf32>
    %94 = math.exp %93 : vector<2x128xf32>
    %cst_18 = arith.constant 1.000000e+00 : f32
    %95 = vector.broadcast %cst_18 : f32 to vector<2x128xf32>
    %96 = arith.addf %95, %94 : vector<2x128xf32>
    %97 = arith.divf %95, %96 : vector<2x128xf32>
    %98 = math.tanh %92 : vector<2x128xf32>
    %99 = vector.extract_strided_slice %97 {offsets = [0, 32], sizes = [2, 32], strides = [1, 1]} : vector<2x128xf32> to vector<2x32xf32>
    %100 = arith.mulf %99, %66 : vector<2x32xf32>
    %101 = vector.extract_strided_slice %97 {offsets = [0, 0], sizes = [2, 32], strides = [1, 1]} : vector<2x128xf32> to vector<2x32xf32>
    %102 = vector.extract_strided_slice %98 {offsets = [0, 64], sizes = [2, 32], strides = [1, 1]} : vector<2x128xf32> to vector<2x32xf32>
    %103 = arith.mulf %101, %102 : vector<2x32xf32>
    %104 = arith.addf %100, %103 : vector<2x32xf32>
    %105 = vector.extract_strided_slice %97 {offsets = [0, 96], sizes = [2, 32], strides = [1, 1]} : vector<2x128xf32> to vector<2x32xf32>
    %106 = math.tanh %104 : vector<2x32xf32>
    %107 = arith.mulf %105, %106 : vector<2x32xf32>
    %108 = tpu.concatenate %89, %107 in 1 : vector<2x32xf32>, vector<2x32xf32> -> vector<2x64xf32>
    %cst_19 = arith.constant dense<0.000000e+00> : vector<2x256xf32>
    %109 = tpu.matmul %108, %0, %cst_19 {dimension_numbers = #tpu.dot_dimension_numbers<[1], [0], [0], [1], [0, 0, 1, 1], [], []>, precision = #tpu.contract_precision<fp32>} : vector<2x64xf32>, vector<64x256xf32>, vector<2x256xf32> -> vector<2x256xf32>
    %110 = vector.extract_strided_slice %11 {offsets = [6, 0], sizes = [2, 128], strides = [1, 1]} : vector<16x128xf32> to vector<2x128xf32>
    %111 = vector.extract_strided_slice %109 {offsets = [0, 0], sizes = [2, 128], strides = [1, 1]} : vector<2x256xf32> to vector<2x128xf32>
    %112 = arith.addf %110, %111 : vector<2x128xf32>
    %113 = arith.negf %112 : vector<2x128xf32>
    %114 = math.exp %113 : vector<2x128xf32>
    %cst_20 = arith.constant 1.000000e+00 : f32
    %115 = vector.broadcast %cst_20 : f32 to vector<2x128xf32>
    %116 = arith.addf %115, %114 : vector<2x128xf32>
    %117 = arith.divf %115, %116 : vector<2x128xf32>
    %118 = math.tanh %112 : vector<2x128xf32>
    %119 = vector.extract_strided_slice %117 {offsets = [0, 32], sizes = [2, 32], strides = [1, 1]} : vector<2x128xf32> to vector<2x32xf32>
    %120 = arith.mulf %119, %86 : vector<2x32xf32>
    %121 = vector.extract_strided_slice %117 {offsets = [0, 0], sizes = [2, 32], strides = [1, 1]} : vector<2x128xf32> to vector<2x32xf32>
    %122 = vector.extract_strided_slice %118 {offsets = [0, 64], sizes = [2, 32], strides = [1, 1]} : vector<2x128xf32> to vector<2x32xf32>
    %123 = arith.mulf %121, %122 : vector<2x32xf32>
    %124 = arith.addf %120, %123 : vector<2x32xf32>
    %125 = vector.extract_strided_slice %117 {offsets = [0, 96], sizes = [2, 32], strides = [1, 1]} : vector<2x128xf32> to vector<2x32xf32>
    %126 = math.tanh %124 : vector<2x32xf32>
    %127 = arith.mulf %125, %126 : vector<2x32xf32>
    %128 = vector.extract_strided_slice %109 {offsets = [0, 128], sizes = [2, 128], strides = [1, 1]} : vector<2x256xf32> to vector<2x128xf32>
    %129 = vector.broadcast %3 : vector<1x128xf32> to vector<2x128xf32>
    %130 = arith.addf %128, %129 : vector<2x128xf32>
    %131 = arith.negf %130 : vector<2x128xf32>
    %132 = math.exp %131 : vector<2x128xf32>
    %cst_21 = arith.constant 1.000000e+00 : f32
    %133 = vector.broadcast %cst_21 : f32 to vector<2x128xf32>
    %134 = arith.addf %133, %132 : vector<2x128xf32>
    %135 = arith.divf %133, %134 : vector<2x128xf32>
    %136 = math.tanh %130 : vector<2x128xf32>
    %137 = vector.extract_strided_slice %135 {offsets = [0, 32], sizes = [2, 32], strides = [1, 1]} : vector<2x128xf32> to vector<2x32xf32>
    %138 = arith.mulf %137, %104 : vector<2x32xf32>
    %139 = vector.extract_strided_slice %135 {offsets = [0, 0], sizes = [2, 32], strides = [1, 1]} : vector<2x128xf32> to vector<2x32xf32>
    %140 = vector.extract_strided_slice %136 {offsets = [0, 64], sizes = [2, 32], strides = [1, 1]} : vector<2x128xf32> to vector<2x32xf32>
    %141 = arith.mulf %139, %140 : vector<2x32xf32>
    %142 = arith.addf %138, %141 : vector<2x32xf32>
    %143 = vector.extract_strided_slice %135 {offsets = [0, 96], sizes = [2, 32], strides = [1, 1]} : vector<2x128xf32> to vector<2x32xf32>
    %144 = math.tanh %142 : vector<2x32xf32>
    %145 = arith.mulf %143, %144 : vector<2x32xf32>
    %146 = tpu.concatenate %127, %145 in 1 : vector<2x32xf32>, vector<2x32xf32> -> vector<2x64xf32>
    %cst_22 = arith.constant dense<0.000000e+00> : vector<2x256xf32>
    %147 = tpu.matmul %146, %0, %cst_22 {dimension_numbers = #tpu.dot_dimension_numbers<[1], [0], [0], [1], [0, 0, 1, 1], [], []>, precision = #tpu.contract_precision<fp32>} : vector<2x64xf32>, vector<64x256xf32>, vector<2x256xf32> -> vector<2x256xf32>
    %148 = vector.extract_strided_slice %11 {offsets = [8, 0], sizes = [2, 128], strides = [1, 1]} : vector<16x128xf32> to vector<2x128xf32>
    %149 = vector.extract_strided_slice %147 {offsets = [0, 0], sizes = [2, 128], strides = [1, 1]} : vector<2x256xf32> to vector<2x128xf32>
    %150 = arith.addf %148, %149 : vector<2x128xf32>
    %151 = arith.negf %150 : vector<2x128xf32>
    %152 = math.exp %151 : vector<2x128xf32>
    %cst_23 = arith.constant 1.000000e+00 : f32
    %153 = vector.broadcast %cst_23 : f32 to vector<2x128xf32>
    %154 = arith.addf %153, %152 : vector<2x128xf32>
    %155 = arith.divf %153, %154 : vector<2x128xf32>
    %156 = math.tanh %150 : vector<2x128xf32>
    %157 = vector.extract_strided_slice %155 {offsets = [0, 32], sizes = [2, 32], strides = [1, 1]} : vector<2x128xf32> to vector<2x32xf32>
    %158 = arith.mulf %157, %124 : vector<2x32xf32>
    %159 = vector.extract_strided_slice %155 {offsets = [0, 0], sizes = [2, 32], strides = [1, 1]} : vector<2x128xf32> to vector<2x32xf32>
    %160 = vector.extract_strided_slice %156 {offsets = [0, 64], sizes = [2, 32], strides = [1, 1]} : vector<2x128xf32> to vector<2x32xf32>
    %161 = arith.mulf %159, %160 : vector<2x32xf32>
    %162 = arith.addf %158, %161 : vector<2x32xf32>
    %163 = vector.extract_strided_slice %155 {offsets = [0, 96], sizes = [2, 32], strides = [1, 1]} : vector<2x128xf32> to vector<2x32xf32>
    %164 = math.tanh %162 : vector<2x32xf32>
    %165 = arith.mulf %163, %164 : vector<2x32xf32>
    %166 = vector.extract_strided_slice %147 {offsets = [0, 128], sizes = [2, 128], strides = [1, 1]} : vector<2x256xf32> to vector<2x128xf32>
    %167 = vector.broadcast %3 : vector<1x128xf32> to vector<2x128xf32>
    %168 = arith.addf %166, %167 : vector<2x128xf32>
    %169 = arith.negf %168 : vector<2x128xf32>
    %170 = math.exp %169 : vector<2x128xf32>
    %cst_24 = arith.constant 1.000000e+00 : f32
    %171 = vector.broadcast %cst_24 : f32 to vector<2x128xf32>
    %172 = arith.addf %171, %170 : vector<2x128xf32>
    %173 = arith.divf %171, %172 : vector<2x128xf32>
    %174 = math.tanh %168 : vector<2x128xf32>
    %175 = vector.extract_strided_slice %173 {offsets = [0, 32], sizes = [2, 32], strides = [1, 1]} : vector<2x128xf32> to vector<2x32xf32>
    %176 = arith.mulf %175, %142 : vector<2x32xf32>
    %177 = vector.extract_strided_slice %173 {offsets = [0, 0], sizes = [2, 32], strides = [1, 1]} : vector<2x128xf32> to vector<2x32xf32>
    %178 = vector.extract_strided_slice %174 {offsets = [0, 64], sizes = [2, 32], strides = [1, 1]} : vector<2x128xf32> to vector<2x32xf32>
    %179 = arith.mulf %177, %178 : vector<2x32xf32>
    %180 = arith.addf %176, %179 : vector<2x32xf32>
    %181 = vector.extract_strided_slice %173 {offsets = [0, 96], sizes = [2, 32], strides = [1, 1]} : vector<2x128xf32> to vector<2x32xf32>
    %182 = math.tanh %180 : vector<2x32xf32>
    %183 = arith.mulf %181, %182 : vector<2x32xf32>
    %184 = tpu.concatenate %165, %183 in 1 : vector<2x32xf32>, vector<2x32xf32> -> vector<2x64xf32>
    %cst_25 = arith.constant dense<0.000000e+00> : vector<2x256xf32>
    %185 = tpu.matmul %184, %0, %cst_25 {dimension_numbers = #tpu.dot_dimension_numbers<[1], [0], [0], [1], [0, 0, 1, 1], [], []>, precision = #tpu.contract_precision<fp32>} : vector<2x64xf32>, vector<64x256xf32>, vector<2x256xf32> -> vector<2x256xf32>
    %186 = vector.extract_strided_slice %11 {offsets = [10, 0], sizes = [2, 128], strides = [1, 1]} : vector<16x128xf32> to vector<2x128xf32>
    %187 = vector.extract_strided_slice %185 {offsets = [0, 0], sizes = [2, 128], strides = [1, 1]} : vector<2x256xf32> to vector<2x128xf32>
    %188 = arith.addf %186, %187 : vector<2x128xf32>
    %189 = arith.negf %188 : vector<2x128xf32>
    %190 = math.exp %189 : vector<2x128xf32>
    %cst_26 = arith.constant 1.000000e+00 : f32
    %191 = vector.broadcast %cst_26 : f32 to vector<2x128xf32>
    %192 = arith.addf %191, %190 : vector<2x128xf32>
    %193 = arith.divf %191, %192 : vector<2x128xf32>
    %194 = math.tanh %188 : vector<2x128xf32>
    %195 = vector.extract_strided_slice %193 {offsets = [0, 32], sizes = [2, 32], strides = [1, 1]} : vector<2x128xf32> to vector<2x32xf32>
    %196 = arith.mulf %195, %162 : vector<2x32xf32>
    %197 = vector.extract_strided_slice %193 {offsets = [0, 0], sizes = [2, 32], strides = [1, 1]} : vector<2x128xf32> to vector<2x32xf32>
    %198 = vector.extract_strided_slice %194 {offsets = [0, 64], sizes = [2, 32], strides = [1, 1]} : vector<2x128xf32> to vector<2x32xf32>
    %199 = arith.mulf %197, %198 : vector<2x32xf32>
    %200 = arith.addf %196, %199 : vector<2x32xf32>
    %201 = vector.extract_strided_slice %193 {offsets = [0, 96], sizes = [2, 32], strides = [1, 1]} : vector<2x128xf32> to vector<2x32xf32>
    %202 = math.tanh %200 : vector<2x32xf32>
    %203 = arith.mulf %201, %202 : vector<2x32xf32>
    %204 = vector.extract_strided_slice %185 {offsets = [0, 128], sizes = [2, 128], strides = [1, 1]} : vector<2x256xf32> to vector<2x128xf32>
    %205 = vector.broadcast %3 : vector<1x128xf32> to vector<2x128xf32>
    %206 = arith.addf %204, %205 : vector<2x128xf32>
    %207 = arith.negf %206 : vector<2x128xf32>
    %208 = math.exp %207 : vector<2x128xf32>
    %cst_27 = arith.constant 1.000000e+00 : f32
    %209 = vector.broadcast %cst_27 : f32 to vector<2x128xf32>
    %210 = arith.addf %209, %208 : vector<2x128xf32>
    %211 = arith.divf %209, %210 : vector<2x128xf32>
    %212 = math.tanh %206 : vector<2x128xf32>
    %213 = vector.extract_strided_slice %211 {offsets = [0, 32], sizes = [2, 32], strides = [1, 1]} : vector<2x128xf32> to vector<2x32xf32>
    %214 = arith.mulf %213, %180 : vector<2x32xf32>
    %215 = vector.extract_strided_slice %211 {offsets = [0, 0], sizes = [2, 32], strides = [1, 1]} : vector<2x128xf32> to vector<2x32xf32>
    %216 = vector.extract_strided_slice %212 {offsets = [0, 64], sizes = [2, 32], strides = [1, 1]} : vector<2x128xf32> to vector<2x32xf32>
    %217 = arith.mulf %215, %216 : vector<2x32xf32>
    %218 = arith.addf %214, %217 : vector<2x32xf32>
    %219 = vector.extract_strided_slice %211 {offsets = [0, 96], sizes = [2, 32], strides = [1, 1]} : vector<2x128xf32> to vector<2x32xf32>
    %220 = math.tanh %218 : vector<2x32xf32>
    %221 = arith.mulf %219, %220 : vector<2x32xf32>
    %222 = tpu.concatenate %203, %221 in 1 : vector<2x32xf32>, vector<2x32xf32> -> vector<2x64xf32>
    %cst_28 = arith.constant dense<0.000000e+00> : vector<2x256xf32>
    %223 = tpu.matmul %222, %0, %cst_28 {dimension_numbers = #tpu.dot_dimension_numbers<[1], [0], [0], [1], [0, 0, 1, 1], [], []>, precision = #tpu.contract_precision<fp32>} : vector<2x64xf32>, vector<64x256xf32>, vector<2x256xf32> -> vector<2x256xf32>
    %224 = vector.extract_strided_slice %11 {offsets = [12, 0], sizes = [2, 128], strides = [1, 1]} : vector<16x128xf32> to vector<2x128xf32>
    %225 = vector.extract_strided_slice %223 {offsets = [0, 0], sizes = [2, 128], strides = [1, 1]} : vector<2x256xf32> to vector<2x128xf32>
    %226 = arith.addf %224, %225 : vector<2x128xf32>
    %227 = arith.negf %226 : vector<2x128xf32>
    %228 = math.exp %227 : vector<2x128xf32>
    %cst_29 = arith.constant 1.000000e+00 : f32
    %229 = vector.broadcast %cst_29 : f32 to vector<2x128xf32>
    %230 = arith.addf %229, %228 : vector<2x128xf32>
    %231 = arith.divf %229, %230 : vector<2x128xf32>
    %232 = math.tanh %226 : vector<2x128xf32>
    %233 = vector.extract_strided_slice %231 {offsets = [0, 32], sizes = [2, 32], strides = [1, 1]} : vector<2x128xf32> to vector<2x32xf32>
    %234 = arith.mulf %233, %200 : vector<2x32xf32>
    %235 = vector.extract_strided_slice %231 {offsets = [0, 0], sizes = [2, 32], strides = [1, 1]} : vector<2x128xf32> to vector<2x32xf32>
    %236 = vector.extract_strided_slice %232 {offsets = [0, 64], sizes = [2, 32], strides = [1, 1]} : vector<2x128xf32> to vector<2x32xf32>
    %237 = arith.mulf %235, %236 : vector<2x32xf32>
    %238 = arith.addf %234, %237 : vector<2x32xf32>
    %239 = vector.extract_strided_slice %231 {offsets = [0, 96], sizes = [2, 32], strides = [1, 1]} : vector<2x128xf32> to vector<2x32xf32>
    %240 = math.tanh %238 : vector<2x32xf32>
    %241 = arith.mulf %239, %240 : vector<2x32xf32>
    %242 = vector.extract_strided_slice %223 {offsets = [0, 128], sizes = [2, 128], strides = [1, 1]} : vector<2x256xf32> to vector<2x128xf32>
    %243 = vector.broadcast %3 : vector<1x128xf32> to vector<2x128xf32>
    %244 = arith.addf %242, %243 : vector<2x128xf32>
    %245 = arith.negf %244 : vector<2x128xf32>
    %246 = math.exp %245 : vector<2x128xf32>
    %cst_30 = arith.constant 1.000000e+00 : f32
    %247 = vector.broadcast %cst_30 : f32 to vector<2x128xf32>
    %248 = arith.addf %247, %246 : vector<2x128xf32>
    %249 = arith.divf %247, %248 : vector<2x128xf32>
    %250 = math.tanh %244 : vector<2x128xf32>
    %251 = vector.extract_strided_slice %249 {offsets = [0, 32], sizes = [2, 32], strides = [1, 1]} : vector<2x128xf32> to vector<2x32xf32>
    %252 = arith.mulf %251, %218 : vector<2x32xf32>
    %253 = vector.extract_strided_slice %249 {offsets = [0, 0], sizes = [2, 32], strides = [1, 1]} : vector<2x128xf32> to vector<2x32xf32>
    %254 = vector.extract_strided_slice %250 {offsets = [0, 64], sizes = [2, 32], strides = [1, 1]} : vector<2x128xf32> to vector<2x32xf32>
    %255 = arith.mulf %253, %254 : vector<2x32xf32>
    %256 = arith.addf %252, %255 : vector<2x32xf32>
    %257 = vector.extract_strided_slice %249 {offsets = [0, 96], sizes = [2, 32], strides = [1, 1]} : vector<2x128xf32> to vector<2x32xf32>
    %258 = math.tanh %256 : vector<2x32xf32>
    %259 = arith.mulf %257, %258 : vector<2x32xf32>
    %260 = tpu.concatenate %241, %259 in 1 : vector<2x32xf32>, vector<2x32xf32> -> vector<2x64xf32>
    %cst_31 = arith.constant dense<0.000000e+00> : vector<2x256xf32>
    %261 = tpu.matmul %260, %0, %cst_31 {dimension_numbers = #tpu.dot_dimension_numbers<[1], [0], [0], [1], [0, 0, 1, 1], [], []>, precision = #tpu.contract_precision<fp32>} : vector<2x64xf32>, vector<64x256xf32>, vector<2x256xf32> -> vector<2x256xf32>
    %262 = vector.extract_strided_slice %11 {offsets = [14, 0], sizes = [2, 128], strides = [1, 1]} : vector<16x128xf32> to vector<2x128xf32>
    %263 = vector.extract_strided_slice %261 {offsets = [0, 0], sizes = [2, 128], strides = [1, 1]} : vector<2x256xf32> to vector<2x128xf32>
    %264 = arith.addf %262, %263 : vector<2x128xf32>
    %265 = arith.negf %264 : vector<2x128xf32>
    %266 = math.exp %265 : vector<2x128xf32>
    %cst_32 = arith.constant 1.000000e+00 : f32
    %267 = vector.broadcast %cst_32 : f32 to vector<2x128xf32>
    %268 = arith.addf %267, %266 : vector<2x128xf32>
    %269 = arith.divf %267, %268 : vector<2x128xf32>
    %270 = math.tanh %264 : vector<2x128xf32>
    %271 = vector.extract_strided_slice %269 {offsets = [0, 32], sizes = [2, 32], strides = [1, 1]} : vector<2x128xf32> to vector<2x32xf32>
    %272 = arith.mulf %271, %238 : vector<2x32xf32>
    %273 = vector.extract_strided_slice %269 {offsets = [0, 0], sizes = [2, 32], strides = [1, 1]} : vector<2x128xf32> to vector<2x32xf32>
    %274 = vector.extract_strided_slice %270 {offsets = [0, 64], sizes = [2, 32], strides = [1, 1]} : vector<2x128xf32> to vector<2x32xf32>
    %275 = arith.mulf %273, %274 : vector<2x32xf32>
    %276 = arith.addf %272, %275 : vector<2x32xf32>
    %277 = vector.extract_strided_slice %269 {offsets = [0, 96], sizes = [2, 32], strides = [1, 1]} : vector<2x128xf32> to vector<2x32xf32>
    %278 = math.tanh %276 : vector<2x32xf32>
    %279 = arith.mulf %277, %278 : vector<2x32xf32>
    %280 = vector.extract_strided_slice %261 {offsets = [0, 128], sizes = [2, 128], strides = [1, 1]} : vector<2x256xf32> to vector<2x128xf32>
    %281 = vector.broadcast %3 : vector<1x128xf32> to vector<2x128xf32>
    %282 = arith.addf %280, %281 : vector<2x128xf32>
    %283 = arith.negf %282 : vector<2x128xf32>
    %284 = math.exp %283 : vector<2x128xf32>
    %cst_33 = arith.constant 1.000000e+00 : f32
    %285 = vector.broadcast %cst_33 : f32 to vector<2x128xf32>
    %286 = arith.addf %285, %284 : vector<2x128xf32>
    %287 = arith.divf %285, %286 : vector<2x128xf32>
    %288 = math.tanh %282 : vector<2x128xf32>
    %289 = vector.extract_strided_slice %287 {offsets = [0, 32], sizes = [2, 32], strides = [1, 1]} : vector<2x128xf32> to vector<2x32xf32>
    %290 = arith.mulf %289, %256 : vector<2x32xf32>
    %291 = vector.extract_strided_slice %287 {offsets = [0, 0], sizes = [2, 32], strides = [1, 1]} : vector<2x128xf32> to vector<2x32xf32>
    %292 = vector.extract_strided_slice %288 {offsets = [0, 64], sizes = [2, 32], strides = [1, 1]} : vector<2x128xf32> to vector<2x32xf32>
    %293 = arith.mulf %291, %292 : vector<2x32xf32>
    %294 = arith.addf %290, %293 : vector<2x32xf32>
    %295 = vector.extract_strided_slice %287 {offsets = [0, 96], sizes = [2, 32], strides = [1, 1]} : vector<2x128xf32> to vector<2x32xf32>
    %296 = math.tanh %294 : vector<2x32xf32>
    %297 = arith.mulf %295, %296 : vector<2x32xf32>
    %298 = tpu.concatenate %279, %297 in 1 : vector<2x32xf32>, vector<2x32xf32> -> vector<2x64xf32>
    %cst_34 = arith.constant dense<0.000000e+00> : vector<2x256xf32>
    %299 = tpu.matmul %298, %0, %cst_34 {dimension_numbers = #tpu.dot_dimension_numbers<[1], [0], [0], [1], [0, 0, 1, 1], [], []>, precision = #tpu.contract_precision<fp32>} : vector<2x64xf32>, vector<64x256xf32>, vector<2x256xf32> -> vector<2x256xf32>
    %300 = vector.extract_strided_slice %299 {offsets = [0, 128], sizes = [2, 128], strides = [1, 1]} : vector<2x256xf32> to vector<2x128xf32>
    %301 = vector.broadcast %3 : vector<1x128xf32> to vector<2x128xf32>
    %302 = arith.addf %300, %301 : vector<2x128xf32>
    %303 = arith.negf %302 : vector<2x128xf32>
    %304 = math.exp %303 : vector<2x128xf32>
    %cst_35 = arith.constant 1.000000e+00 : f32
    %305 = vector.broadcast %cst_35 : f32 to vector<2x128xf32>
    %306 = arith.addf %305, %304 : vector<2x128xf32>
    %307 = arith.divf %305, %306 : vector<2x128xf32>
    %308 = math.tanh %302 : vector<2x128xf32>
    %309 = vector.extract_strided_slice %307 {offsets = [0, 32], sizes = [2, 32], strides = [1, 1]} : vector<2x128xf32> to vector<2x32xf32>
    %310 = arith.mulf %309, %294 : vector<2x32xf32>
    %311 = vector.extract_strided_slice %307 {offsets = [0, 0], sizes = [2, 32], strides = [1, 1]} : vector<2x128xf32> to vector<2x32xf32>
    %312 = vector.extract_strided_slice %308 {offsets = [0, 64], sizes = [2, 32], strides = [1, 1]} : vector<2x128xf32> to vector<2x32xf32>
    %313 = arith.mulf %311, %312 : vector<2x32xf32>
    %314 = arith.addf %310, %313 : vector<2x32xf32>
    %315 = vector.extract_strided_slice %307 {offsets = [0, 96], sizes = [2, 32], strides = [1, 1]} : vector<2x128xf32> to vector<2x32xf32>
    %316 = math.tanh %314 : vector<2x32xf32>
    %317 = arith.mulf %315, %316 : vector<2x32xf32>
    %c88 = arith.constant 88 : index
    %c0_36 = arith.constant 0 : index
    %318 = vector.load %arg1[%c88, %c0_36] : memref<128x256xf32, #tpu.memory_space<vmem>>, vector<32x128xf32>
    %c120 = arith.constant 120 : index
    %c0_37 = arith.constant 0 : index
    %319 = vector.load %arg1[%c120, %c0_37] : memref<128x256xf32, #tpu.memory_space<vmem>>, vector<1x128xf32>
    %cst_38 = arith.constant dense<0.000000e+00> : vector<2x128xf32>
    %320 = tpu.matmul %317, %318, %cst_38 {dimension_numbers = #tpu.dot_dimension_numbers<[1], [0], [0], [1], [0, 0, 1, 1], [], []>, precision = #tpu.contract_precision<fp32>} : vector<2x32xf32>, vector<32x128xf32>, vector<2x128xf32> -> vector<2x128xf32>
    %321 = vector.broadcast %319 : vector<1x128xf32> to vector<2x128xf32>
    %322 = arith.addf %320, %321 : vector<2x128xf32>
    %323 = tpu.concatenate %279, %317, %276, %314 in 1 : vector<2x32xf32>, vector<2x32xf32>, vector<2x32xf32>, vector<2x32xf32> -> vector<2x128xf32>
    %cst_39 = arith.constant 0.000000e+00 : f32
    %324 = vector.broadcast %cst_39 : f32 to vector<4x128xf32>
    %325 = tpu.concatenate %323, %322, %324 in 0 : vector<2x128xf32>, vector<2x128xf32>, vector<4x128xf32> -> vector<8x128xf32>
    %c0_40 = arith.constant 0 : index
    %c0_41 = arith.constant 0 : index
    %326 = vector.load %arg2[%c0_40, %c0_41] : memref<8x128xf32, #tpu.memory_space<vmem>>, vector<8x128xf32>
    tpu.vector_store %arg2[%c0_40, %c0_41], %325 {strides = array<i32>} : memref<8x128xf32, #tpu.memory_space<vmem>>, vector<8x128xf32>,
    return
  }
}

</mosaic_0001>

<bundles_post_ra>
// kernel: eq.8
= control target key start
LH: loop header
LB: loop body
LE: loop exit
PB: predicated region body
PF: predicated region fallthrough
CT: control target
= control target key end

     0   :  { %s67_s10 = smov 14   ;;  %s68_s11 = smov 10   ;;  %vm3_vm0 = vcmask 15360   ;;  %vm9_vm1 = vcmask 130160   ;;  %vm15_vm2 = vcmask 113760   ;;  %vm21_vm3 = vcmask 97360   ;;  %s111_s0 = inlined_call_operand.vmem [shape: s32[8,2], index: 0, kind: input, shape index: {}]   ;;  %s112_s1 = inlined_call_operand.vmem [shape: s32[16], index: 1, kind: output, shape index: {}]  }
   0x1   :  { %v53_v0 = vld [vmem:[%s111_s0 + $0x7] sm:$0x1]   ;;  %v55_v1 = vld [vmem:[%s111_s0 + $0x5] sm:$0x1]   ;;  %v54_v2 = vld [vmem:[%s111_s0 + $0x6] sm:$0x1]  }
   0x2   :  { %7 = vrot.lane.b32.xlu0 %v53_v0, %s67_s10  ;;  %19 = vrot.lane.b32.xlu1 %v55_v1, %s68_s11  ;;  %v56_v3 = vld [vmem:[%s111_s0 + $0x4] sm:$0x1]   ;;  %v2_v4 = vld [vmem:[%s111_s0] sm:$0x1]   ;;  %s69_s18 = smov 12   ;;  %s70_s19 = smov 8  }
   0x3   :  { %4 = vst.msk [vmem:[#allocation0] sm:$0x1] %vm3_vm0, %v2_v4   ;;  %v57_v5 = vld [vmem:[%s111_s0 + $0x3] sm:$0x1]   ;;  %v58_v6 = vld [vmem:[%s111_s0 + $0x2] sm:$0x1]  }
   0x4   :  { %s71_s24 = smov 6   ;;  %s72_s25 = smov 4   ;;  %v59_v7 = vld [vmem:[%s111_s0 + $0x1] sm:$0x1]   ;;  %vm27_vm4 = vcmask 80960   ;;  %vm33_vm5 = vcmask 64560  }
   0x5   :  { %s73_s0 = smov 2   ;;  %vm39_vm6 = vcmask 48160   ;;  %vm45_vm7 = vcmask 31760  }
   0x6   :  { %13 = vrot.lane.b32.xlu0 %v54_v2, %s69_s18  ;;  %25 = vrot.lane.b32.xlu1 %v56_v3, %s70_s19 }
   0xa   :  { %31 = vrot.lane.b32.xlu0 %v57_v5, %s71_s24  ;;  %37 = vrot.lane.b32.xlu1 %v58_v6, %s72_s25 }
   0xe   :  { %43 = vrot.lane.b32.xlu0 %v59_v7, %s73_s0 }
  0x74   :  { %v8_v8 = vpop.permute.xlu0 %7   ;;  %v20_v9 = vpop.permute.xlu1 %19  }
  0x75   :  { %10 = vst.msk [vmem:[#allocation0] sm:$0x1] %vm9_vm1, %v8_v8  }
  0x78   :  { %v14_v10 = vpop.permute.xlu0 %13   ;;  %v26_v11 = vpop.permute.xlu1 %25  }
  0x79   :  { %16 = vst.msk [vmem:[#allocation0] sm:$0x1] %vm15_vm2, %v14_v10  }
  0x7a   :  { %22 = vst.msk [vmem:[#allocation0] sm:$0x1] %vm21_vm3, %v20_v9  }
  0x7b   :  { %28 = vst.msk [vmem:[#allocation0] sm:$0x1] %vm27_vm4, %v26_v11  }
  0x7c   :  { %v32_v12 = vpop.permute.xlu0 %31   ;;  %v38_v13 = vpop.permute.xlu1 %37  }
  0x7d   :  { %34 = vst.msk [vmem:[#allocation0] sm:$0x1] %vm33_vm5, %v32_v12  }
  0x7e   :  { %40 = vst.msk [vmem:[#allocation0] sm:$0x1] %vm39_vm6, %v38_v13  }
  0x80   :  { %v44_v14 = vpop.permute.xlu0 %43  }
  0x81   :  { %46 = vst.msk [vmem:[#allocation0] sm:$0x1] %vm45_vm7, %v44_v14  }
  0x88   :  { %v50_v15 = vld [vmem:[#allocation0] sm:$0x1] }
  0x89   :  { %52 = vst [vmem:[%s112_s1] sm:$0x1] %v50_v15 }

// kernel: music_rnn_forward.1
= control target key start
LH: loop header
LB: loop body
LE: loop exit
PB: predicated region body
PF: predicated region fallthrough
CT: control target
= control target key end

     0   :  { %7 = vsyncpa [#allocation3], 0  ;;  %s8807_s9 = smov [#allocation2]   ;;  %s9939_s0 = inlined_call_operand.vmem [shape: f32[24,128], index: 0, kind: input, shape index: {}]   ;;  %s9940_s1 = inlined_call_operand.hbm [shape: f32[128,256], index: 1, kind: input, shape index: {}]   ;;  %s9941_s2 = inlined_call_operand.vmem [shape: f32[8,128], index: 2, kind: output, shape index: {}]  }
   0x1   :  { %s15_s10 = sshll.u32 %s8807_s9, 4  ;;  %s8783_s13 = scalar_lea.hbm %s9940_s1, 4096  ;;  %s16_s10 = int_to_ptr.vmem [resolvable:$true] %s15_s10 }
   0x2   :  { %p8784_p0 = scmp.ne.s32.totalorder %s9940_s1, %s8783_s13  ;;  %p8787_p1 = scmp.lt.u32.totalorder %s8783_s13, %s9940_s1 }
   0x4   :  { %p8789_p2 = pnand %p8787_p1, %p8784_p0 }
   0x6   :  { %8792 = shalt.err (!%p8789_p2)
}
   0x7   :  { %s8793_s18 = scalar_lea.vmem %s16_s10, 4096  ;;  %p8798_p4 = scmp.lt.s32.totalorder %s16_s10, %s16_s10 }
   0x8   :  { %p8794_p3 = scmp.ne.s32.totalorder %s16_s10, %s8793_s18  ;;  %p8799_p5 = scmp.lt.s32.totalorder %s8793_s18, %s8793_s18 }
   0xa   :  { %p8800_p6 = por %p8799_p5, %p8798_p4 }
   0xc   :  { %p8801_p7 = pnand %p8800_p6, %p8794_p3 }
   0xe   :  { %8804 = shalt.err (!%p8801_p7)
}
   0xf   :  { %s8808_s19 = smov 256   ;;  %s8809_s20 = smov 16  }
  0x10   :  { %21 = dma.hbm_to_vmem [thread:$0]  %s9940_s1, 4096, %s16_s10, [#allocation3], %s8808_s19, %s8808_s19, %s8809_s20  }
  0x11   :  { %8805 = dma.done.wait [#allocation3], 4096  }
  0x12   :  { %8806 = vsyncadd [#allocation3], 4294963200  ;;  %vm48_vm0 = vcmask 130048   ;;  %v41_v0 = vld [vmem:[#allocation2 + $0x80] sm:$0xff]  ;;  %v42_v1 = vld [vmem:[#allocation2 + $0x90] sm:$0xff]  ;;  %vm558_vm1 = vcmask 523264  }
  0x13   :  { %v45_v2 = vld [vmem:[%s9939_s0] sm:$0xff]  ;;  %v56_v3 = vand.u32 4294901760, %v41_v0  ;;  %v59_v4 = vand.u32 4294901760, %v42_v1  ;;  %v46_v5 = vld [vmem:[%s9939_s0 + $0x8] sm:$0xff]  ;;  %v8851_v8 = vld [vmem:[#allocation2 + $0x18] sm:$0xff]  ;;  %s8812_s28 = smov 96  }
  0x14   :  { %v50_v6 = vsel %vm48_vm0, %v45_v2, 0  ;;  %v8849_v7 = vld [vmem:[#allocation2 + $0x8] sm:$0xff]  ;;  %v53_v9 = vsel %vm48_vm0, %v46_v5, 0  ;;  %v566_v12 = vand.u32 4294901760, %v8851_v8  ;;  %v8857_v13 = vld [vmem:[#allocation2] sm:$0xff]  ;;  %v8859_v14 = vld [vmem:[#allocation2 + $0x10] sm:$0xff] }
  0x15   :  { %v8853_v10 = vand.u32 4294901760, %v50_v6  ;;  %v562_v11 = vand.u32 4294901760, %v8849_v7  ;;  %v8861_v15 = vpack.c.bf16 %v59_v4, %v56_v3  ;;  %v8863_v16 = vand.u32 4294901760, %v53_v9  ;;  %v8869_v19 = vld [vmem:[#allocation2 + $0x28] sm:$0xff]  ;;  %v8871_v20 = vld [vmem:[#allocation2 + $0x38] sm:$0xff]  ;;  %v8873_v21 = vld [vmem:[#allocation2 + $0x20] sm:$0xff] }
  0x16   :  { %v8865_v17 = vsub.f32 %v41_v0, %v56_v3  ;;  %v8867_v18 = vsub.f32 %v42_v1, %v59_v4  ;;  %v564_v24 = vand.u32 4294901760, %v8857_v13  ;;  %v568_v25 = vand.u32 4294901760, %v8859_v14  ;;  %v8887_v26 = vld [vmem:[#allocation2 + $0x30] sm:$0xff]  ;;  %v8896_v31 = vld [vmem:[#allocation2 + $0x48] sm:$0xff]  ;;  %v8898_v32 = vld [vmem:[#allocation2 + $0x58] sm:$0xff]  ;;  %s8813_s29 = smov 32  }
  0x17   :  { %v8876_v22 = vsub.f32 %v50_v6, %v8853_v10  ;;  %v8882_v23 = vpack.c.bf16 %v566_v12, %v562_v11  ;;  %7531 = vmatprep.mubr.f32.mxu0 %v8853_v10  ;;  %7629 = vmatprep.subr.bf16.mxu1 %v8861_v15  ;;  %v8891_v27 = vsub.f32 %v53_v9, %v8863_v16  ;;  %v570_v30 = vand.u32 4294901760, %v8869_v19  ;;  %v8917_v41 = vld [vmem:[#allocation2 + $0x40] sm:$0xff]  ;;  %v8926_v46 = vld [vmem:[#allocation2 + $0x50] sm:$0xff]  ;;  %v8928_v47 = vld [vmem:[#allocation2 + $0x68] sm:$0xff] }
  0x18   :  { %v145_v28 = vand.u32 4294901760, %v8865_v17  ;;  %v152_v29 = vand.u32 4294901760, %v8867_v18  ;;  %7631 = vmatpush3.bf16.msra.mxu1 %v8861_v15  ;;  %v8904_v34 = vpack.c.bf16 %v568_v25, %v564_v24  ;;  %v574_v35 = vand.u32 4294901760, %v8871_v20  ;;  %v8930_v48 = vld [vmem:[#allocation2 + $0x78] sm:$0xff]  ;;  %v8939_v53 = vld [vmem:[#allocation2 + $0x60] sm:$0xff]  ;;  %v8941_v54 = vld [vmem:[#allocation2 + $0x70] sm:$0xff] }
  0x19   :  { %v124_v33 = vand.u32 4294901760, %v8876_v22  ;;  %v572_v36 = vand.u32 4294901760, %v8873_v21  ;;  %7653 = vmatprep.subr.bf16.mxu1 %v8882_v23  ;;  %v9948_v37 = vand.u32 4294901760, %v8891_v27  ;;  %v576_v40 = vand.u32 4294901760, %v8887_v26  ;;  %v8946_v55 = vld [vmem:[%s9939_s0 + $0x10] sm:$0x3] }
  0x1a   :  { %v146_v38 = vsub.f32 %v8865_v17, %v145_v28  ;;  %v153_v39 = vsub.f32 %v8867_v18, %v152_v29  ;;  %v8922_v43 = vpack.c.bf16 %v574_v35, %v570_v30  ;;  %v578_v44 = vand.u32 4294901760, %v8896_v31  ;;  %s8811_s0 = smov 64  }
  0x1b   :  { %v125_v42 = vsub.f32 %v8876_v22, %v124_v33  ;;  %v582_v45 = vand.u32 4294901760, %v8898_v32  ;;  %v135_v49 = vsub.f32 %v8891_v27, %v9948_v37  ;;  %v8937_v52 = vpack.c.bf16 %v576_v40, %v572_v36 }
  0x1c   :  { %v147_v50 = vand.u32 4294901760, %v146_v38  ;;  %v154_v51 = vand.u32 4294901760, %v153_v39  ;;  %v7636_v58 = vpack.c.bf16 %v8867_v18, %v8865_v17  ;;  %v580_v59 = vand.u32 4294901760, %v8917_v41 }
  0x1d   :  { %v126_v56 = vand.u32 4294901760, %v125_v42  ;;  %v8952_v57 = vpack.c.bf16 %v582_v45, %v578_v44  ;;  %v136_v60 = vand.u32 4294901760, %v135_v49  ;;  %v584_v62 = vand.u32 4294901760, %v8926_v46 }
  0x1e   :  { %v7632_v61 = vpack.c.bf16 %v154_v51, %v147_v50  ;;  %v586_v63 = vand.u32 4294901760, %v8928_v47  ;;  %v590_v0 = vand.u32 4294901760, %v8930_v48  ;;  %v588_v1 = vand.u32 4294901760, %v8939_v53 }
  0x1f   :  { %7524 = vmatprep.mubr.f32.mxu1 %v126_v56  ;;  %v592_v2 = vand.u32 4294901760, %v8941_v54  ;;  %v560_v3 = vsel %vm558_vm1, %v8946_v55, 0  ;;  %v8968_v4 = vpack.c.bf16 %v584_v62, %v580_v59  ;;  %v8975_v6 = vsub.f32 %v8849_v7, %v562_v11 }
  0x20   :  { %7525 = vmatmul.mubr.f32.vlgmr.msra.gmra.mrb[0].mxu1 %v136_v60  ;;  %7633 = vmatprep.subr.bf16.mxu0 %v7632_v61  ;;  %v8970_v5 = vand.u32 4294901760, %v560_v3  ;;  %v8980_v9 = vsub.f32 %v8851_v8, %v566_v12  ;;  %v8987_v38 = vpack.c.bf16 %v590_v0, %v586_v63  ;;  %v8996_v11 = vsub.f32 %v8857_v13, %v564_v24 }
  0x21   :  { %7655 = vmatpush1.bf16.msra.mxu1 %v8904_v34  ;;  %7635 = vmatpush3.bf16.msra.mxu0 %v7632_v61  ;;  %v8993_v7 = vpack.c.bf16 %v592_v2, %v588_v1  ;;  %v9945_v12 = vand.u32 4294901760, %v8975_v6  ;;  %v9007_v42 = vsub.f32 %v8859_v14, %v568_v25  ;;  %v8810_v49 = vmov 0.0  }
  0x22   :  { %7657 = vmatprep.subr.bf16.mxu1 %v8922_v43  ;;  %7637 = vmatprep.subr.bf16.mxu0 %v7636_v58  ;;  %v9000_v8 = vsub.f32 %v560_v3, %v8970_v5  ;;  %v9943_v39 = vand.u32 4294901760, %v8980_v9  ;;  %v9942_v13 = vand.u32 4294901760, %v8996_v11  ;;  %v9012_v24 = vsub.f32 %v8869_v19, %v570_v30 }
  0x23   :  { %642 = vmatprep.mubr.f32.mxu1 %v8810_v49  ;;  %v9015_v50 = vsub.f32 %v8871_v20, %v574_v35  ;;  %v9018_v51 = vsub.f32 %v8873_v21, %v572_v36  ;;  %v656_v14 = vsub.f32 %v8975_v6, %v9945_v12  ;;  %v9947_v19 = vand.u32 4294901760, %v9007_v42 }
  0x24   :  { %7532 = vmatmul.mubr.f32.vlgmr.msra.gmra.mrb[0].mxu0 %v8863_v16  ;;  %v9944_v56 = vand.u32 4294901760, %v9000_v8  ;;  %v668_v25 = vsub.f32 %v8980_v9, %v9943_v39  ;;  %v662_v20 = vsub.f32 %v8996_v11, %v9942_v13  ;;  %v9946_v21 = vand.u32 4294901760, %v9012_v24 }
  0x25   :  { %7659 = vmatpush1.bf16.msra.mxu1 %v8937_v52  ;;  %7639 = vmatpush3.bf16.msra.mxu0 %v7636_v58  ;;  %v9949_v30 = vand.u32 4294901760, %v9015_v50  ;;  %v685_v35 = vand.u32 4294901760, %v9018_v51  ;;  %v657_v60 = vand.u32 4294901760, %v656_v14  ;;  %v674_v61 = vsub.f32 %v9007_v42, %v9947_v19 }
  0x26   :  { %7661 = vmatprep.subr.bf16.mxu1 %v8952_v57  ;;  %7538 = vmatprep.mubr.f32.mxu0 %v8876_v22  ;;  %v646_v36 = vsub.f32 %v9000_v8, %v9944_v56  ;;  %v669_v58 = vand.u32 4294901760, %v668_v25  ;;  %v663_v3 = vand.u32 4294901760, %v662_v20  ;;  %v680_v13 = vsub.f32 %v9012_v24, %v9946_v21 }
  0x27   :  { %7641 = vmatprep.subr.bf16.mxu0 %v8861_v15  ;;  %v692_v39 = vsub.f32 %v9015_v50, %v9949_v30  ;;  %v686_v14 = vsub.f32 %v9018_v51, %v685_v35  ;;  %v675_v12 = vand.u32 4294901760, %v674_v61  ;;  %v9059_v20 = vsub.f32 %v8887_v26, %v576_v40 }
  0x28   :  { %v647_v25 = vand.u32 4294901760, %v646_v36  ;;  %v9054_v56 = vpack.c.bf16 %v669_v58, %v657_v60  ;;  %v681_v21 = vand.u32 4294901760, %v680_v13  ;;  %v9065_v30 = vsub.f32 %v8896_v31, %v578_v44 }
  0x29   :  { %7663 = vmatpush1.bf16.msra.mxu1 %v8968_v4  ;;  %v693_v19 = vand.u32 4294901760, %v692_v39  ;;  %v687_v37 = vand.u32 4294901760, %v686_v14  ;;  %v9068_v36 = vpack.c.bf16 %v675_v12, %v663_v3  ;;  %v697_v60 = vand.u32 4294901760, %v9059_v20 }
  0x2a   :  { %7665 = vmatprep.subr.bf16.mxu1 %v8987_v38  ;;  %v9074_v26 = vsub.f32 %v8898_v32, %v582_v45  ;;  %v7644_v40 = vpack.c.bf16 %v152_v29, %v145_v28  ;;  %v703_v31 = vand.u32 4294901760, %v9065_v30  ;;  %v9086_v44 = vsub.f32 %v8917_v41, %v580_v59 }
  0x2b   :  { %v9080_v39 = vpack.c.bf16 %v693_v19, %v681_v21  ;;  %v9091_v12 = vsub.f32 %v8926_v46, %v584_v62  ;;  %v698_v17 = vsub.f32 %v9059_v20, %v697_v60  ;;  %v9101_v28 = vsub.f32 %v8928_v47, %v586_v63 }
  0x2c   :  { %7539 = vmatmul.mubr.f32.vlgmr.msra.gmra.mrb[0].mxu0 %v8891_v27  ;;  %v715_v18 = vand.u32 4294901760, %v9074_v26  ;;  %v9106_v29 = vsub.f32 %v8930_v48, %v590_v0  ;;  %v704_v32 = vsub.f32 %v9065_v30, %v703_v31  ;;  %v709_v41 = vand.u32 4294901760, %v9086_v44 }
  0x2d   :  { %7667 = vmatpush1.bf16.msra.mxu1 %v8993_v7  ;;  %7643 = vmatpush3.bf16.msra.mxu0 %v8861_v15  ;;  %v721_v45 = vand.u32 4294901760, %v9091_v12  ;;  %v9118_v46 = vsub.f32 %v8939_v53, %v588_v1  ;;  %v699_v47 = vand.u32 4294901760, %v698_v17  ;;  %v727_v59 = vand.u32 4294901760, %v9101_v28 }
  0x2e   :  { %7669 = vmatprep.subr.bf16.mxu1 %v9054_v56  ;;  %7545 = vmatprep.mubr.f32.mxu0 %v124_v33  ;;  %v716_v48 = vsub.f32 %v9074_v26, %v715_v18  ;;  %v739_v62 = vand.u32 4294901760, %v9106_v29  ;;  %v705_v63 = vand.u32 4294901760, %v704_v32  ;;  %v710_v53 = vsub.f32 %v9086_v44, %v709_v41 }
  0x2f   :  { %7645 = vmatprep.subr.bf16.mxu0 %v7644_v40  ;;  %v722_v22 = vsub.f32 %v9091_v12, %v721_v45  ;;  %v733_v33 = vand.u32 4294901760, %v9118_v46  ;;  %v9135_v0 = vpack.c.bf16 %v699_v47, %v687_v37  ;;  %v728_v13 = vsub.f32 %v9101_v28, %v727_v59 }
  0x30   :  { %648 = vmatmul.mubr.f32.vlgmr.msra.gmra.mrb[2].mxu1 %v647_v25  ;;  %v717_v1 = vand.u32 4294901760, %v716_v48  ;;  %v740_v19 = vsub.f32 %v9106_v29, %v739_v62  ;;  %v711_v21 = vand.u32 4294901760, %v710_v53  ;;  %v744_v37 = vsub.f32 %v8941_v54, %v592_v2 }
  0x31   :  { %7671 = vmatpush1.bf16.msra.mxu1 %v9068_v36  ;;  %v723_v58 = vand.u32 4294901760, %v722_v22  ;;  %v734_v61 = vsub.f32 %v9118_v46, %v733_v33  ;;  %797 = vmatprep.mubr.f32.mxu1 %v8810_v49  ;;  %v729_v14 = vand.u32 4294901760, %v728_v13  ;;  %v9950_v32 = vand.u32 4294901760, %v8891_v27 }
  0x32   :  { %7673 = vmatprep.subr.bf16.mxu1 %v9080_v39  ;;  %v9152_v3 = vpack.c.bf16 %v717_v1, %v705_v63  ;;  %v741_v25 = vand.u32 4294901760, %v740_v19  ;;  %v745_v17 = vand.u32 4294901760, %v744_v37  ;;  %v9951_v63 = vand.u32 4294901760, %v8975_v6 }
  0x33   :  { %v9157_v47 = vpack.c.bf16 %v723_v58, %v711_v21  ;;  %v735_v48 = vand.u32 4294901760, %v734_v61  ;;  %v9952_v22 = vand.u32 4294901760, %v8980_v9  ;;  %v9182_v13 = vpack.c.bf16 %v9007_v42, %v8996_v11 }
  0x34   :  { %7546 = vmatmul.mubr.f32.vlgmr.msra.gmra.mrb[0].mxu0 %v9950_v32  ;;  %v746_v53 = vsub.f32 %v744_v37, %v745_v17  ;;  %v9161_v54 = vpack.c.bf16 %v741_v25, %v729_v14  ;;  %v9208_v21 = vpack.c.bf16 %v9074_v26, %v9065_v30  ;;  %v9955_v58 = vand.u32 4294901760, %v9012_v24 }
  0x35   :  { %7675 = vmatpush1.bf16.msra.mxu1 %v9135_v0  ;;  %7647 = vmatpush3.bf16.msra.mxu0 %v7644_v40  ;;  %v9170_v40 = vpack.c.bf16 %v8980_v9, %v8975_v6  ;;  %v9176_v1 = vpack.c.bf16 %v9952_v22, %v9951_v63  ;;  %v9189_v6 = vpack.c.bf16 %v9015_v50, %v9012_v24  ;;  %v9956_v61 = vand.u32 4294901760, %v9015_v50 }
  0x36   :  { %7677 = vmatprep.subr.bf16.mxu1 %v9152_v3  ;;  %7552 = vmatprep.mubr.f32.mxu0 %v8853_v10  ;;  %v747_v2 = vand.u32 4294901760, %v746_v53  ;;  %v9196_v9 = vpack.c.bf16 %v9059_v20, %v9018_v51  ;;  %v9232_v24 = vpack.c.bf16 %v9106_v29, %v9101_v28  ;;  %v9244_v50 = vpack.c.bf16 %v744_v37, %v9118_v46 }
  0x37   :  { %7649 = vmatprep.subr.bf16.mxu0 %v8861_v15  ;;  %v9214_v14 = vpack.c.bf16 %v9956_v61, %v9955_v58  ;;  %v9251_v51 = vpack.c.bf16 %v721_v45, %v709_v41  ;;  %v9259_v30 = vpack.c.bf16 %v739_v62, %v727_v59  ;;  %v9957_v20 = vand.u32 4294901760, %v9000_v8 }
  0x38   :  { %v9165_v27 = vpack.c.bf16 %v747_v2, %v735_v48  ;;  %vm557_vm2 = vcmask 261120   ;;  %vm8815_vm3 = vmmov 0   ;;  %vm7432_vm4 = vcmask 785408  }
  0x39   :  { %7679 = vmatpush1.bf16.msra.mxu1 %v9157_v47  ;;  %vm7440_vm5 = vcmask 1041408   ;;  %vm7442_vm6 = vcmask 1043456  }
  0x3a   :  { %7681 = vmatprep.subr.bf16.mxu1 %v9161_v54 }
  0x3c   :  { %7553 = vmatmul.mubr.f32.vlgmr.msra.gmra.mrb[0].mxu0 %v8863_v16 }
  0x3d   :  { %7683 = vmatpush1.bf16.msra.mxu1 %v9165_v27  ;;  %7651 = vmatpush3.bf16.msra.mxu0 %v8861_v15  ;;  %v9953_v15 = vand.u32 4294901760, %v8996_v11  ;;  %v9220_v11 = vpack.c.bf16 %v9091_v12, %v9086_v44 }
  0x3e   :  { %7685 = vmatprep.subr.bf16.mxu1 %v9170_v40  ;;  %7559 = vmatprep.mubr.f32.mxu0 %v8853_v10  ;;  %v9954_v10 = vand.u32 4294901760, %v9007_v42  ;;  %v9227_v42 = vpack.c.bf16 %v697_v60, %v685_v35  ;;  %v9267_v35 = vpack.c.bf16 %v745_v17, %v733_v33 }
  0x3f   :  { %7717 = vmatprep.subr.bf16.mxu0 %v9176_v1 }
  0x40   :  { %799 = vmatmul.mubr.f32.vlgmr.msra.gmra.mrb[4].mxu1 %v8970_v5  ;;  %v9203_v19 = vpack.c.bf16 %v9954_v10, %v9953_v15 }
  0x41   :  { %7687 = vmatpush1.bf16.msra.mxu1 %v9182_v13  ;;  %900 = vmatprep.mubr.f32.mxu1 %v8810_v49 }
  0x42   :  { %7689 = vmatprep.subr.bf16.mxu1 %v9189_v6 }
  0x44   :  { %7560 = vmatmul.mubr.f32.vlgmr.msra.gmra.mrb[0].mxu0 %v8863_v16  ;;  %v9239_v16 = vpack.c.bf16 %v715_v18, %v703_v31 }
  0x45   :  { %7691 = vmatpush1.bf16.msra.mxu1 %v9196_v9  ;;  %7719 = vmatpush1.bf16.msra.mxu0 %v9203_v19 }
  0x46   :  { %7693 = vmatprep.subr.bf16.mxu1 %v9208_v21  ;;  %7721 = vmatprep.subr.bf16.mxu0 %v9214_v14 }
  0x47   :  { %1109 = vmatprep.mubr.f32.mxu0 %v8810_v49 }
  0x49   :  { %7695 = vmatpush1.bf16.msra.mxu1 %v9220_v11  ;;  %7723 = vmatpush1.bf16.msra.mxu0 %v9227_v42 }
  0x4a   :  { %7697 = vmatprep.subr.bf16.mxu1 %v9232_v24  ;;  %7725 = vmatprep.subr.bf16.mxu0 %v9239_v16 }
  0x4d   :  { %7699 = vmatpush1.bf16.msra.mxu1 %v9244_v50  ;;  %7727 = vmatpush1.bf16.msra.mxu0 %v9251_v51 }
  0x4e   :  { %7701 = vmatprep.subr.bf16.mxu1 %v8882_v23  ;;  %7729 = vmatprep.subr.bf16.mxu0 %v9259_v30 }
  0x50   :  { %903 = vmatmul.mubr.f32.vlgmr.msra.gmra.mrb[6].mxu1 %v9000_v8  ;;  %v43_v8 = vld [vmem:[#allocation2 + $0xa0] ss:$0 sm:$0xff] }
  0x51   :  { %7703 = vmatpush1.bf16.msra.mxu1 %v8904_v34  ;;  %988 = vmatprep.mubr.f32.mxu1 %v8810_v49 }
  0x52   :  { %7705 = vmatprep.subr.bf16.mxu1 %v8922_v43  ;;  %7731 = vmatpush1.bf16.msra.mxu0 %v9267_v35 }
  0x53   :  { %7749 = vmatprep.subr.bf16.mxu0 %v8882_v23 }
  0x55   :  { %7707 = vmatpush1.bf16.msra.mxu1 %v8937_v52  ;;  %1111 = vmatmul.mubr.f32.vlgmr.msra.gmra.mrb[2].mxu0 %v8970_v5 }
  0x56   :  { %7709 = vmatprep.subr.bf16.mxu1 %v8952_v57  ;;  %7751 = vmatpush1.bf16.msra.mxu0 %v8904_v34 }
  0x57   :  { %7753 = vmatprep.subr.bf16.mxu0 %v8922_v43  ;;  %1319 = vmatprep.mubr.f32.mxu0 %v8810_v49 }
  0x59   :  { %7711 = vmatpush1.bf16.msra.mxu1 %v8968_v4 }
  0x5a   :  { %7713 = vmatprep.subr.bf16.mxu1 %v8987_v38  ;;  %7755 = vmatpush1.bf16.msra.mxu0 %v8937_v52 }
  0x5b   :  { %7757 = vmatprep.subr.bf16.mxu0 %v8952_v57 }
  0x5d   :  { %7715 = vmatpush1.bf16.msra.mxu1 %v8993_v7 }
  0x5e   :  { %7733 = vmatprep.subr.bf16.mxu1 %v8882_v23  ;;  %7759 = vmatpush1.bf16.msra.mxu0 %v8968_v4 }
  0x5f   :  { %7761 = vmatprep.subr.bf16.mxu0 %v8987_v38 }
  0x60   :  { %992 = vmatmul.mubr.f32.vlgmr.msra.gmra.mrb[8].mxu1 %v9957_v20 }
  0x61   :  { %7735 = vmatpush1.bf16.msra.mxu1 %v8904_v34  ;;  %1196 = vmatprep.mubr.f32.mxu1 %v8810_v49 }
  0x62   :  { %7737 = vmatprep.subr.bf16.mxu1 %v8922_v43  ;;  %7763 = vmatpush1.bf16.msra.mxu0 %v8993_v7 }
  0x63   :  { %7765 = vmatprep.subr.bf16.mxu0 %v9054_v56 }
  0x65   :  { %7739 = vmatpush1.bf16.msra.mxu1 %v8937_v52 }
  0x66   :  { %7741 = vmatprep.subr.bf16.mxu1 %v8952_v57 }
  0x69   :  { %7743 = vmatpush1.bf16.msra.mxu1 %v8968_v4 }
  0x6a   :  { %7745 = vmatprep.subr.bf16.mxu1 %v8987_v38 }
  0x6d   :  { %7747 = vmatpush1.bf16.msra.mxu1 %v8993_v7 }
  0x6e   :  { %7845 = vmatprep.subr.bf16.mxu1 %v8882_v23 }
  0x70   :  { %1198 = vmatmul.mubr.f32.vlgmr.msra.gmra.mrb[10].mxu1 %v8970_v5 }
  0x71   :  { %7847 = vmatpush1.bf16.msra.mxu1 %v8904_v34  ;;  %2039 = vmatprep.mubr.f32.mxu1 %v8810_v49 }
  0x72   :  { %7849 = vmatprep.subr.bf16.mxu1 %v8922_v43 }
  0x75   :  { %7851 = vmatpush1.bf16.msra.mxu1 %v8937_v52 }
  0x76   :  { %7853 = vmatprep.subr.bf16.mxu1 %v8952_v57 }
  0x79   :  { %7855 = vmatpush1.bf16.msra.mxu1 %v8968_v4 }
  0x7a   :  { %7857 = vmatprep.subr.bf16.mxu1 %v8987_v38 }
  0x7d   :  { %7859 = vmatpush1.bf16.msra.mxu1 %v8993_v7 }
  0x7e   :  { %7861 = vmatprep.subr.bf16.mxu1 %v9054_v56 }
  0xf3   :  { %v7526_v5 = vpop.f32.mrb[0].mxu1 }
  0xf4   :  { %v139_v60 = vadd.f32 %v7526_v5, %v43_v8  ;;  %v128_v26 = vpop.f32.mrb[1].mxu1 }
  0xf5   :  { %v129_v29 = vadd.f32 %v128_v26, %v43_v8 }
 0x103   :  { %v649_v31 = vpop.f32.mrb[2].mxu1 }
 0x104   :  { %v651_v44 = vpop.f32.mrb[3].mxu1 }
 0x113   :  { %v800_v12 = vpop.f32.mrb[4].mxu1 }
 0x114   :  { %v801_v18 = vadd.f32 %v800_v12, %v649_v31  ;;  %v802_v28 = vpop.f32.mrb[5].mxu1 }
 0x117   :  { %v7561_v41 = vpop.f32.mrb[0].mxu0 }
 0x118   :  { %v9312_v45 = vadd.f32 %v7561_v41, %v139_v60  ;;  %v547_v46 = vpop.f32.mrb[1].mxu0 }
 0x119   :  { %v9314_v59 = vadd.f32 %v547_v46, %v129_v29 }
 0x123   :  { %v904_v62 = vpop.f32.mrb[6].mxu1 }
 0x124   :  { %v905_v33 = vadd.f32 %v904_v62, %v801_v18  ;;  %v906_v37 = vpop.f32.mrb[7].mxu1 }
 0x128   :  { %v1112_v25 = vpop.f32.mrb[2].mxu0 }
 0x129   :  { %v1114_v17 = vpop.f32.mrb[3].mxu0 }
 0x133   :  { %v993_v32 = vpop.f32.mrb[8].mxu1 }
 0x134   :  { %v994_v48 = vadd.f32 %v993_v32, %v905_v33  ;;  %v995_v53 = vpop.f32.mrb[9].mxu1 }
 0x135   :  { %v9382_v53 = vld [vmem:[#allocation2 + $0xa8] ss:$0 sm:$0xff] }
 0x136   :  { %v1113_v2 = vadd.f32 %v1112_v25, %v994_v48 }
 0x143   :  { %v1199_v63 = vpop.f32.mrb[10].mxu1 }
 0x144   :  { %v1200_v22 = vadd.f32 %v1199_v63, %v1113_v2  ;;  %v1201_v15 = vpop.f32.mrb[11].mxu1 }
 0x146   :  { %v1203_v10 = vadd.f32 %v9314_v59, %v1200_v22 }
 0x148   :  { %8654 = vtanh.f32 %v1203_v10  ;;  %v7450_v61 = vmul.f32 -1.442695, %v1203_v10 }
 0x14a   :  { %8656 = vpow2.f32 %v7450_v61 }
 0x152   :  { %v8655_v58 = vpop.eup %8654 }
 0x153   :  { %1216 = vrot.lane.b32.xlu0 %v8655_v58, %s8811_s0 }
 0x154   :  { %v8657_v20 = vpop.eup %8656 }
 0x155   :  { %v1207_v8 = vadd.f32 1.0, %v8657_v20 }
 0x157   :  { %1211 = vrot.lane.b32.xlu0 %v8946_v55, %s8812_s28  ;;  %8658 = vrcp.f32 %v1207_v8 }
 0x161   :  { %v8659_v5 = vpop.eup %8658 }
 0x1c5   :  { %v1217_v60 = vpop.permute.xlu0 %1216 }
 0x1c6   :  { %v1219_v26 = vmul.f32 %v8659_v5, %v1217_v60 }
 0x1c8   :  { %1221 = vrot.lane.b32.xlu1 %v1219_v26, %s8813_s29 }
 0x1c9   :  { %v1212_v31 = vpop.permute.xlu0 %1211 }
 0x1ca   :  { %v1214_v44 = vmul.f32 %v8659_v5, %v1212_v31 }
 0x23a   :  { %v1222_v12 = vpop.permute.xlu1 %1221 }
 0x23b   :  { %v9320_v18 = vadd.f32 %v1222_v12, %v1214_v44 }
 0x23d   :  { %8660 = vtanh.f32 %v9320_v18 }
 0x247   :  { %v8661_v28 = vpop.eup %8660 }
 0x248   :  { %1227 = vrot.lane.b32.xlu1 %v8661_v28, %s8811_s0 }
 0x2ba   :  { %v1228_v29 = vpop.permute.xlu1 %1227 }
 0x2bb   :  { %v1230_v41 = vmul.f32 %v8659_v5, %v1228_v29 }
 0x2bd   :  { %1232 = vrot.lane.b32.xlu0 %v1230_v41, %s8813_s29 }
 0x32f   :  { %v1233_v46 = vpop.permute.xlu0 %1232 }
 0x330   :  { %v1235_v62 = vsel %vm557_vm2, %v1233_v46, %v8946_v55 }
 0x331   :  { %v1237_v33 = vsel %vm558_vm1, %v1235_v62, 0  ;;  %v1898_v62 = vrot.slane %v9320_v18, 6 }
 0x332   :  { %v1320_v37 = vand.u32 4294901760, %v1237_v33 }
 0x334   :  { %v1321_v25 = vsub.f32 %v1237_v33, %v1320_v37 }
 0x336   :  { %v1322_v17 = vand.u32 4294901760, %v1321_v25 }
 0x338   :  { %v1323_v32 = vsub.f32 %v1321_v25, %v1322_v17 }
 0x33a   :  { %v1324_v48 = vand.u32 4294901760, %v1323_v32 }
 0x33c   :  { %1325 = vmatmul.mubr.f32.vlgmr.msra.gmra.mrb[4].mxu0 %v1324_v48 }
 0x33d   :  { %7767 = vmatpush1.bf16.msra.mxu0 %v9068_v36  ;;  %1475 = vmatprep.mubr.f32.mxu0 %v8810_v49 }
 0x33e   :  { %7769 = vmatprep.subr.bf16.mxu0 %v9080_v39 }
 0x341   :  { %7771 = vmatpush1.bf16.msra.mxu0 %v9135_v0 }
 0x342   :  { %7773 = vmatprep.subr.bf16.mxu0 %v9152_v3 }
 0x345   :  { %7775 = vmatpush1.bf16.msra.mxu0 %v9157_v47 }
 0x346   :  { %7777 = vmatprep.subr.bf16.mxu0 %v9161_v54 }
 0x349   :  { %7779 = vmatpush1.bf16.msra.mxu0 %v9165_v27 }
 0x34a   :  { %7781 = vmatprep.subr.bf16.mxu0 %v9170_v40 }
 0x34c   :  { %1477 = vmatmul.mubr.f32.vlgmr.msra.gmra.mrb[4].mxu0 %v1320_v37 }
 0x34d   :  { %7783 = vmatpush1.bf16.msra.mxu0 %v9182_v13  ;;  %1579 = vmatprep.mubr.f32.mxu0 %v8810_v49 }
 0x34e   :  { %7785 = vmatprep.subr.bf16.mxu0 %v9189_v6 }
 0x351   :  { %7787 = vmatpush1.bf16.msra.mxu0 %v9196_v9 }
 0x352   :  { %7789 = vmatprep.subr.bf16.mxu0 %v9208_v21 }
 0x355   :  { %7791 = vmatpush1.bf16.msra.mxu0 %v9220_v11 }
 0x356   :  { %7793 = vmatprep.subr.bf16.mxu0 %v9232_v24 }
 0x359   :  { %7795 = vmatpush1.bf16.msra.mxu0 %v9244_v50 }
 0x35a   :  { %7797 = vmatprep.subr.bf16.mxu0 %v8882_v23 }
 0x35c   :  { %1582 = vmatmul.mubr.f32.vlgmr.msra.gmra.mrb[4].mxu0 %v1321_v25 }
 0x35d   :  { %7799 = vmatpush1.bf16.msra.mxu0 %v8904_v34  ;;  %1668 = vmatprep.mubr.f32.mxu0 %v8810_v49 }
 0x35e   :  { %7801 = vmatprep.subr.bf16.mxu0 %v8922_v43 }
 0x361   :  { %7803 = vmatpush1.bf16.msra.mxu0 %v8937_v52 }
 0x362   :  { %7805 = vmatprep.subr.bf16.mxu0 %v8952_v57 }
 0x365   :  { %7807 = vmatpush1.bf16.msra.mxu0 %v8968_v4 }
 0x366   :  { %7809 = vmatprep.subr.bf16.mxu0 %v8987_v38 }
 0x369   :  { %7811 = vmatpush1.bf16.msra.mxu0 %v8993_v7 }
 0x36a   :  { %7813 = vmatprep.subr.bf16.mxu0 %v9176_v1 }
 0x36c   :  { %1672 = vmatmul.mubr.f32.vlgmr.msra.gmra.mrb[4].mxu0 %v1322_v17 }
 0x36d   :  { %7815 = vmatpush1.bf16.msra.mxu0 %v9203_v19  ;;  %1790 = vmatprep.mubr.f32.mxu0 %v8810_v49 }
 0x36e   :  { %7817 = vmatprep.subr.bf16.mxu0 %v9214_v14 }
 0x371   :  { %7819 = vmatpush1.bf16.msra.mxu0 %v9227_v42 }
 0x372   :  { %7821 = vmatprep.subr.bf16.mxu0 %v9239_v16 }
 0x375   :  { %7823 = vmatpush1.bf16.msra.mxu0 %v9251_v51 }
 0x376   :  { %7825 = vmatprep.subr.bf16.mxu0 %v9259_v30 }
 0x379   :  { %7827 = vmatpush1.bf16.msra.mxu0 %v9267_v35 }
 0x37a   :  { %7829 = vmatprep.subr.bf16.mxu0 %v8882_v23 }
 0x37c   :  { %1792 = vmatmul.mubr.f32.vlgmr.msra.gmra.mrb[4].mxu0 %v1320_v37 }
 0x37d   :  { %7831 = vmatpush1.bf16.msra.mxu0 %v8904_v34  ;;  %1878 = vmatprep.mubr.f32.mxu0 %v8810_v49 }
 0x37e   :  { %7833 = vmatprep.subr.bf16.mxu0 %v8922_v43 }
 0x381   :  { %7835 = vmatpush1.bf16.msra.mxu0 %v8937_v52 }
 0x382   :  { %7837 = vmatprep.subr.bf16.mxu0 %v8952_v57 }
 0x385   :  { %7839 = vmatpush1.bf16.msra.mxu0 %v8968_v4 }
 0x386   :  { %7841 = vmatprep.subr.bf16.mxu0 %v8987_v38 }
 0x389   :  { %7843 = vmatpush1.bf16.msra.mxu0 %v8993_v7 }
 0x38a   :  { %7941 = vmatprep.subr.bf16.mxu0 %v8882_v23 }
 0x38c   :  { %1880 = vmatmul.mubr.f32.vlgmr.msra.gmra.mrb[4].mxu0 %v1320_v37 }
 0x38d   :  { %7943 = vmatpush1.bf16.msra.mxu0 %v8904_v34  ;;  %2756 = vmatprep.mubr.f32.mxu0 %v8810_v49 }
 0x38e   :  { %7945 = vmatprep.subr.bf16.mxu0 %v8922_v43 }
 0x391   :  { %7947 = vmatpush1.bf16.msra.mxu0 %v8937_v52 }
 0x392   :  { %7949 = vmatprep.subr.bf16.mxu0 %v8952_v57 }
 0x395   :  { %7951 = vmatpush1.bf16.msra.mxu0 %v8968_v4 }
 0x396   :  { %7953 = vmatprep.subr.bf16.mxu0 %v8987_v38 }
 0x399   :  { %7955 = vmatpush1.bf16.msra.mxu0 %v8993_v7 }
 0x39a   :  { %7957 = vmatprep.subr.bf16.mxu0 %v9054_v56 }
 0x45f   :  { %v1881_v2 = vpop.f32.mrb[4].mxu0 }
 0x460   :  { %v1887_v63 = vrot.slane %v1881_v2, 6  ;;  %v1883_v22 = vpop.f32.mrb[5].mxu0 }
 0x461   :  { %v1917_v15 = vadd.f32 %v1883_v22, %v9382_v53 }
 0x462   :  { %v1889_v10 = vadd.f32 %v9314_v59, %v1887_v63 }
 0x463   :  { %8662 = vtanh.f32 %v1917_v15  ;;  %v7452_v20 = vmul.f32 -1.442695, %v1917_v15 }
 0x464   :  { %8664 = vtanh.f32 %v1889_v10  ;;  %v7451_v8 = vmul.f32 -1.442695, %v1889_v10 }
 0x465   :  { %8666 = vpow2.f32 %v7452_v20 }
 0x466   :  { %8668 = vpow2.f32 %v7451_v8 }
 0x46d   :  { %v8663_v58 = vpop.eup %8662 }
 0x46e   :  { %v8665_v61 = vpop.eup %8664  ;;  %1930 = vrot.lane.b32.xlu1 %v8663_v58, %s8811_s0 }
 0x46f   :  { %1902 = vrot.lane.b32.xlu0 %v8665_v61, %s8811_s0  ;;  %v8667_v5 = vpop.eup %8666 }
 0x470   :  { %v8669_v60 = vpop.eup %8668  ;;  %v1921_v26 = vadd.f32 1.0, %v8667_v5 }
 0x471   :  { %v1893_v31 = vadd.f32 1.0, %v8669_v60 }
 0x472   :  { %1925 = vrot.lane.b32.xlu1 %v8946_v55, %s8811_s0  ;;  %8670 = vrcp.f32 %v1921_v26 }
 0x473   :  { %8672 = vrcp.f32 %v1893_v31 }
 0x47c   :  { %v8671_v44 = vpop.eup %8670 }
 0x47d   :  { %v8673_v28 = vpop.eup %8672 }
 0x47e   :  { %v1900_v25 = vmul.f32 %v8673_v28, %v1898_v62 }
 0x4e0   :  { %v1931_v12 = vpop.permute.xlu1 %1930 }
 0x4e1   :  { %v1933_v29 = vmul.f32 %v8671_v44, %v1931_v12  ;;  %v1903_v41 = vpop.permute.xlu0 %1902 }
 0x4e2   :  { %v1905_v46 = vmul.f32 %v8673_v28, %v1903_v41 }
 0x4e3   :  { %1935 = vrot.lane.b32.xlu0 %v1933_v29, %s8813_s29 }
 0x4e4   :  { %1907 = vrot.lane.b32.xlu1 %v1905_v46, %s8813_s29  ;;  %v1926_v55 = vpop.permute.xlu1 %1925 }
 0x4e5   :  { %v1928_v33 = vmul.f32 %v8671_v44, %v1926_v55 }
 0x555   :  { %v1936_v37 = vpop.permute.xlu0 %1935 }
 0x556   :  { %v9393_v17 = vadd.f32 %v1936_v37, %v1928_v33  ;;  %v1908_v32 = vpop.permute.xlu1 %1907 }
 0x557   :  { %v9395_v48 = vadd.f32 %v1908_v32, %v1900_v25 }
 0x558   :  { %8674 = vtanh.f32 %v9393_v17 }
 0x559   :  { %8676 = vtanh.f32 %v9395_v48 }
 0x562   :  { %v8675_v2 = vpop.eup %8674 }
 0x563   :  { %v8677_v63 = vpop.eup %8676  ;;  %1941 = vrot.lane.b32.xlu0 %v8675_v2, %s8811_s0 }
 0x564   :  { %1913 = vrot.lane.b32.xlu1 %v8677_v63, %s8811_s0 }
 0x5d5   :  { %v1942_v22 = vpop.permute.xlu0 %1941 }
 0x5d6   :  { %v1944_v18 = vmul.f32 %v8671_v44, %v1942_v22  ;;  %v1914_v15 = vpop.permute.xlu1 %1913 }
 0x5d7   :  { %v1916_v10 = vmul.f32 %v8673_v28, %v1914_v15 }
 0x5d8   :  { %v1950_v58 = vrot.slane %v1944_v18, 6 }
 0x5d9   :  { %1946 = vrot.lane.b32.xlu0 %v1916_v10, %s8813_s29 }
 0x5da   :  { %1951 = vrot.lane.b32.xlu1 %v1950_v58, %s8811_s0 }
 0x64b   :  { %v1947_v61 = vpop.permute.xlu0 %1946 }
 0x64c   :  { %v1952_v20 = vpop.permute.xlu1 %1951 }
 0x64d   :  { %v1954_v8 = vsel %vm557_vm2, %v1947_v61, %v1952_v20 }
 0x64e   :  { %v1956_v5 = vrot.slane %v1954_v8, 2 }
 0x650   :  { %v1957_v60 = vsel %vm558_vm1, %v1956_v5, 0  ;;  %v2618_v5 = vrot.slane %v9395_v48, 6 }
 0x651   :  { %v2040_v26 = vand.u32 4294901760, %v1957_v60 }
 0x653   :  { %v2041_v31 = vsub.f32 %v1957_v60, %v2040_v26 }
 0x655   :  { %v2042_v12 = vand.u32 4294901760, %v2041_v31 }
 0x657   :  { %v2043_v29 = vsub.f32 %v2041_v31, %v2042_v12 }
 0x659   :  { %v2044_v41 = vand.u32 4294901760, %v2043_v29 }
 0x65b   :  { %2045 = vmatmul.mubr.f32.vlgmr.msra.gmra.mrb[12].mxu1 %v2044_v41 }
 0x65c   :  { %7863 = vmatpush1.bf16.msra.mxu1 %v9068_v36  ;;  %2195 = vmatprep.mubr.f32.mxu1 %v8810_v49 }
 0x65d   :  { %7865 = vmatprep.subr.bf16.mxu1 %v9080_v39 }
 0x660   :  { %7867 = vmatpush1.bf16.msra.mxu1 %v9135_v0 }
 0x661   :  { %7869 = vmatprep.subr.bf16.mxu1 %v9152_v3 }
 0x664   :  { %7871 = vmatpush1.bf16.msra.mxu1 %v9157_v47 }
 0x665   :  { %7873 = vmatprep.subr.bf16.mxu1 %v9161_v54 }
 0x668   :  { %7875 = vmatpush1.bf16.msra.mxu1 %v9165_v27 }
 0x669   :  { %7877 = vmatprep.subr.bf16.mxu1 %v9170_v40 }
 0x66b   :  { %2197 = vmatmul.mubr.f32.vlgmr.msra.gmra.mrb[12].mxu1 %v2040_v26 }
 0x66c   :  { %7879 = vmatpush1.bf16.msra.mxu1 %v9182_v13  ;;  %2299 = vmatprep.mubr.f32.mxu1 %v8810_v49 }
 0x66d   :  { %7881 = vmatprep.subr.bf16.mxu1 %v9189_v6 }
 0x670   :  { %7883 = vmatpush1.bf16.msra.mxu1 %v9196_v9 }
 0x671   :  { %7885 = vmatprep.subr.bf16.mxu1 %v9208_v21 }
 0x674   :  { %7887 = vmatpush1.bf16.msra.mxu1 %v9220_v11 }
 0x675   :  { %7889 = vmatprep.subr.bf16.mxu1 %v9232_v24 }
 0x678   :  { %7891 = vmatpush1.bf16.msra.mxu1 %v9244_v50 }
 0x679   :  { %7893 = vmatprep.subr.bf16.mxu1 %v8882_v23 }
 0x67b   :  { %2302 = vmatmul.mubr.f32.vlgmr.msra.gmra.mrb[12].mxu1 %v2041_v31 }
 0x67c   :  { %7895 = vmatpush1.bf16.msra.mxu1 %v8904_v34  ;;  %2388 = vmatprep.mubr.f32.mxu1 %v8810_v49 }
 0x67d   :  { %7897 = vmatprep.subr.bf16.mxu1 %v8922_v43 }
 0x680   :  { %7899 = vmatpush1.bf16.msra.mxu1 %v8937_v52 }
 0x681   :  { %7901 = vmatprep.subr.bf16.mxu1 %v8952_v57 }
 0x684   :  { %7903 = vmatpush1.bf16.msra.mxu1 %v8968_v4 }
 0x685   :  { %7905 = vmatprep.subr.bf16.mxu1 %v8987_v38 }
 0x688   :  { %7907 = vmatpush1.bf16.msra.mxu1 %v8993_v7 }
 0x689   :  { %7909 = vmatprep.subr.bf16.mxu1 %v9176_v1 }
 0x68b   :  { %2392 = vmatmul.mubr.f32.vlgmr.msra.gmra.mrb[12].mxu1 %v2042_v12 }
 0x68c   :  { %7911 = vmatpush1.bf16.msra.mxu1 %v9203_v19  ;;  %2510 = vmatprep.mubr.f32.mxu1 %v8810_v49 }
 0x68d   :  { %7913 = vmatprep.subr.bf16.mxu1 %v9214_v14 }
 0x690   :  { %7915 = vmatpush1.bf16.msra.mxu1 %v9227_v42 }
 0x691   :  { %7917 = vmatprep.subr.bf16.mxu1 %v9239_v16 }
 0x694   :  { %7919 = vmatpush1.bf16.msra.mxu1 %v9251_v51 }
 0x695   :  { %7921 = vmatprep.subr.bf16.mxu1 %v9259_v30 }
 0x698   :  { %7923 = vmatpush1.bf16.msra.mxu1 %v9267_v35 }
 0x699   :  { %7925 = vmatprep.subr.bf16.mxu1 %v8882_v23 }
 0x69b   :  { %2512 = vmatmul.mubr.f32.vlgmr.msra.gmra.mrb[12].mxu1 %v2040_v26 }
 0x69c   :  { %7927 = vmatpush1.bf16.msra.mxu1 %v8904_v34  ;;  %2598 = vmatprep.mubr.f32.mxu1 %v8810_v49 }
 0x69d   :  { %7929 = vmatprep.subr.bf16.mxu1 %v8922_v43 }
 0x6a0   :  { %7931 = vmatpush1.bf16.msra.mxu1 %v8937_v52 }
 0x6a1   :  { %7933 = vmatprep.subr.bf16.mxu1 %v8952_v57 }
 0x6a4   :  { %7935 = vmatpush1.bf16.msra.mxu1 %v8968_v4 }
 0x6a5   :  { %7937 = vmatprep.subr.bf16.mxu1 %v8987_v38 }
 0x6a8   :  { %7939 = vmatpush1.bf16.msra.mxu1 %v8993_v7 }
 0x6a9   :  { %8037 = vmatprep.subr.bf16.mxu1 %v8882_v23 }
 0x6ab   :  { %2600 = vmatmul.mubr.f32.vlgmr.msra.gmra.mrb[12].mxu1 %v2040_v26 }
 0x6ac   :  { %8039 = vmatpush1.bf16.msra.mxu1 %v8904_v34  ;;  %3473 = vmatprep.mubr.f32.mxu1 %v8810_v49 }
 0x6ad   :  { %8041 = vmatprep.subr.bf16.mxu1 %v8922_v43 }
 0x6b0   :  { %8043 = vmatpush1.bf16.msra.mxu1 %v8937_v52 }
 0x6b1   :  { %8045 = vmatprep.subr.bf16.mxu1 %v8952_v57 }
 0x6b4   :  { %8047 = vmatpush1.bf16.msra.mxu1 %v8968_v4 }
 0x6b5   :  { %8049 = vmatprep.subr.bf16.mxu1 %v8987_v38 }
 0x6b8   :  { %8051 = vmatpush1.bf16.msra.mxu1 %v8993_v7 }
 0x6b9   :  { %8053 = vmatprep.subr.bf16.mxu1 %v9054_v56 }
 0x77e   :  { %v2601_v44 = vpop.f32.mrb[12].mxu1 }
 0x77f   :  { %v2607_v28 = vrot.slane %v2601_v44, 4  ;;  %v2603_v46 = vpop.f32.mrb[13].mxu1 }
 0x780   :  { %v2637_v55 = vadd.f32 %v2603_v46, %v9382_v53 }
 0x781   :  { %v2609_v62 = vadd.f32 %v9314_v59, %v2607_v28 }
 0x782   :  { %8678 = vtanh.f32 %v2637_v55  ;;  %v7454_v25 = vmul.f32 -1.442695, %v2637_v55 }
 0x783   :  { %8680 = vtanh.f32 %v2609_v62  ;;  %v7453_v32 = vmul.f32 -1.442695, %v2609_v62 }
 0x784   :  { %8682 = vpow2.f32 %v7454_v25 }
 0x785   :  { %8684 = vpow2.f32 %v7453_v32 }
 0x78c   :  { %v8679_v33 = vpop.eup %8678 }
 0x78d   :  { %v8681_v37 = vpop.eup %8680  ;;  %2647 = vrot.lane.b32.xlu0 %v8679_v33, %s8811_s0 }
 0x78e   :  { %2622 = vrot.lane.b32.xlu1 %v8681_v37, %s8811_s0  ;;  %v8683_v2 = vpop.eup %8682 }
 0x78f   :  { %v8685_v63 = vpop.eup %8684  ;;  %v2641_v22 = vadd.f32 1.0, %v8683_v2 }
 0x790   :  { %v2613_v18 = vadd.f32 1.0, %v8685_v63 }
 0x791   :  { %8686 = vrcp.f32 %v2641_v22 }
 0x792   :  { %8688 = vrcp.f32 %v2613_v18 }
 0x79b   :  { %v8687_v15 = vpop.eup %8686 }
 0x79c   :  { %v8689_v58 = vpop.eup %8688  ;;  %v2645_v60 = vmul.f32 %v8687_v15, %v9393_v17 }
 0x79d   :  { %v2620_v31 = vmul.f32 %v8689_v58, %v2618_v5 }
 0x7ff   :  { %v2648_v10 = vpop.permute.xlu0 %2647 }
 0x800   :  { %v2650_v61 = vmul.f32 %v8687_v15, %v2648_v10  ;;  %v2623_v20 = vpop.permute.xlu1 %2622 }
 0x801   :  { %v2625_v8 = vmul.f32 %v8689_v58, %v2623_v20 }
 0x802   :  { %2652 = vrot.lane.b32.xlu0 %v2650_v61, %s8813_s29 }
 0x803   :  { %2627 = vrot.lane.b32.xlu1 %v2625_v8, %s8813_s29 }
 0x874   :  { %v2653_v26 = vpop.permute.xlu0 %2652 }
 0x875   :  { %v9467_v12 = vadd.f32 %v2653_v26, %v2645_v60  ;;  %v2628_v29 = vpop.permute.xlu1 %2627 }
 0x876   :  { %v9469_v41 = vadd.f32 %v2628_v29, %v2620_v31 }
 0x877   :  { %8690 = vtanh.f32 %v9467_v12 }
 0x878   :  { %8692 = vtanh.f32 %v9469_v41 }
 0x881   :  { %v8691_v44 = vpop.eup %8690 }
 0x882   :  { %v8693_v28 = vpop.eup %8692  ;;  %2658 = vrot.lane.b32.xlu0 %v8691_v44, %s8811_s0 }
 0x883   :  { %2633 = vrot.lane.b32.xlu1 %v8693_v28, %s8811_s0 }
 0x8f4   :  { %v2659_v48 = vpop.permute.xlu0 %2658 }
 0x8f5   :  { %v2661_v46 = vmul.f32 %v8687_v15, %v2659_v48  ;;  %v2634_v17 = vpop.permute.xlu1 %2633 }
 0x8f6   :  { %v2636_v55 = vmul.f32 %v8689_v58, %v2634_v17 }
 0x8f7   :  { %v2667_v62 = vrot.slane %v2661_v46, 4 }
 0x8f8   :  { %2663 = vrot.lane.b32.xlu0 %v2636_v55, %s8813_s29 }
 0x8f9   :  { %2668 = vrot.lane.b32.xlu1 %v2667_v62, %s8811_s0 }
 0x96a   :  { %v2664_v33 = vpop.permute.xlu0 %2663 }
 0x96b   :  { %v2669_v37 = vpop.permute.xlu1 %2668 }
 0x96c   :  { %v2671_v25 = vsel %vm557_vm2, %v2664_v33, %v2669_v37 }
 0x96d   :  { %v2673_v32 = vrot.slane %v2671_v25, 4  ;;  %v3335_v25 = vrot.slane %v9469_v41, 6 }
 0x96f   :  { %v2674_v2 = vsel %vm558_vm1, %v2673_v32, 0 }
 0x970   :  { %v2757_v63 = vand.u32 4294901760, %v2674_v2 }
 0x972   :  { %v2758_v22 = vsub.f32 %v2674_v2, %v2757_v63 }
 0x974   :  { %v2759_v18 = vand.u32 4294901760, %v2758_v22 }
 0x976   :  { %v2760_v10 = vsub.f32 %v2758_v22, %v2759_v18 }
 0x978   :  { %v2761_v61 = vand.u32 4294901760, %v2760_v10 }
 0x97a   :  { %2762 = vmatmul.mubr.f32.vlgmr.msra.gmra.mrb[6].mxu0 %v2761_v61 }
 0x97b   :  { %7959 = vmatpush1.bf16.msra.mxu0 %v9068_v36  ;;  %2912 = vmatprep.mubr.f32.mxu0 %v8810_v49 }
 0x97c   :  { %7961 = vmatprep.subr.bf16.mxu0 %v9080_v39 }
 0x97f   :  { %7963 = vmatpush1.bf16.msra.mxu0 %v9135_v0 }
 0x980   :  { %7965 = vmatprep.subr.bf16.mxu0 %v9152_v3 }
 0x983   :  { %7967 = vmatpush1.bf16.msra.mxu0 %v9157_v47 }
 0x984   :  { %7969 = vmatprep.subr.bf16.mxu0 %v9161_v54 }
 0x987   :  { %7971 = vmatpush1.bf16.msra.mxu0 %v9165_v27 }
 0x988   :  { %7973 = vmatprep.subr.bf16.mxu0 %v9170_v40 }
 0x98a   :  { %2914 = vmatmul.mubr.f32.vlgmr.msra.gmra.mrb[6].mxu0 %v2757_v63 }
 0x98b   :  { %7975 = vmatpush1.bf16.msra.mxu0 %v9182_v13  ;;  %3016 = vmatprep.mubr.f32.mxu0 %v8810_v49 }
 0x98c   :  { %7977 = vmatprep.subr.bf16.mxu0 %v9189_v6 }
 0x98f   :  { %7979 = vmatpush1.bf16.msra.mxu0 %v9196_v9 }
 0x990   :  { %7981 = vmatprep.subr.bf16.mxu0 %v9208_v21 }
 0x993   :  { %7983 = vmatpush1.bf16.msra.mxu0 %v9220_v11 }
 0x994   :  { %7985 = vmatprep.subr.bf16.mxu0 %v9232_v24 }
 0x997   :  { %7987 = vmatpush1.bf16.msra.mxu0 %v9244_v50 }
 0x998   :  { %7989 = vmatprep.subr.bf16.mxu0 %v8882_v23 }
 0x99a   :  { %3019 = vmatmul.mubr.f32.vlgmr.msra.gmra.mrb[6].mxu0 %v2758_v22 }
 0x99b   :  { %7991 = vmatpush1.bf16.msra.mxu0 %v8904_v34  ;;  %3105 = vmatprep.mubr.f32.mxu0 %v8810_v49 }
 0x99c   :  { %7993 = vmatprep.subr.bf16.mxu0 %v8922_v43 }
 0x99f   :  { %7995 = vmatpush1.bf16.msra.mxu0 %v8937_v52 }
 0x9a0   :  { %7997 = vmatprep.subr.bf16.mxu0 %v8952_v57 }
 0x9a3   :  { %7999 = vmatpush1.bf16.msra.mxu0 %v8968_v4 }
 0x9a4   :  { %8001 = vmatprep.subr.bf16.mxu0 %v8987_v38 }
 0x9a7   :  { %8003 = vmatpush1.bf16.msra.mxu0 %v8993_v7 }
 0x9a8   :  { %8005 = vmatprep.subr.bf16.mxu0 %v9176_v1 }
 0x9aa   :  { %3109 = vmatmul.mubr.f32.vlgmr.msra.gmra.mrb[6].mxu0 %v2759_v18 }
 0x9ab   :  { %8007 = vmatpush1.bf16.msra.mxu0 %v9203_v19  ;;  %3227 = vmatprep.mubr.f32.mxu0 %v8810_v49 }
 0x9ac   :  { %8009 = vmatprep.subr.bf16.mxu0 %v9214_v14 }
 0x9af   :  { %8011 = vmatpush1.bf16.msra.mxu0 %v9227_v42 }
 0x9b0   :  { %8013 = vmatprep.subr.bf16.mxu0 %v9239_v16 }
 0x9b3   :  { %8015 = vmatpush1.bf16.msra.mxu0 %v9251_v51 }
 0x9b4   :  { %8017 = vmatprep.subr.bf16.mxu0 %v9259_v30 }
 0x9b7   :  { %8019 = vmatpush1.bf16.msra.mxu0 %v9267_v35 }
 0x9b8   :  { %8021 = vmatprep.subr.bf16.mxu0 %v8882_v23 }
 0x9ba   :  { %3229 = vmatmul.mubr.f32.vlgmr.msra.gmra.mrb[6].mxu0 %v2757_v63 }
 0x9bb   :  { %8023 = vmatpush1.bf16.msra.mxu0 %v8904_v34  ;;  %3315 = vmatprep.mubr.f32.mxu0 %v8810_v49 }
 0x9bc   :  { %8025 = vmatprep.subr.bf16.mxu0 %v8922_v43 }
 0x9bf   :  { %8027 = vmatpush1.bf16.msra.mxu0 %v8937_v52 }
 0x9c0   :  { %8029 = vmatprep.subr.bf16.mxu0 %v8952_v57 }
 0x9c3   :  { %8031 = vmatpush1.bf16.msra.mxu0 %v8968_v4 }
 0x9c4   :  { %8033 = vmatprep.subr.bf16.mxu0 %v8987_v38 }
 0x9c7   :  { %8035 = vmatpush1.bf16.msra.mxu0 %v8993_v7 }
 0x9c8   :  { %8133 = vmatprep.subr.bf16.mxu0 %v8882_v23 }
 0x9ca   :  { %3317 = vmatmul.mubr.f32.vlgmr.msra.gmra.mrb[6].mxu0 %v2757_v63 }
 0x9cb   :  { %8135 = vmatpush1.bf16.msra.mxu0 %v8904_v34  ;;  %4185 = vmatprep.mubr.f32.mxu0 %v8810_v49 }
 0x9cc   :  { %8137 = vmatprep.subr.bf16.mxu0 %v8922_v43 }
 0x9cf   :  { %8139 = vmatpush1.bf16.msra.mxu0 %v8937_v52 }
 0x9d0   :  { %8141 = vmatprep.subr.bf16.mxu0 %v8952_v57 }
 0x9d3   :  { %8143 = vmatpush1.bf16.msra.mxu0 %v8968_v4 }
 0x9d4   :  { %8145 = vmatprep.subr.bf16.mxu0 %v8987_v38 }
 0x9d7   :  { %8147 = vmatpush1.bf16.msra.mxu0 %v8993_v7 }
 0x9d8   :  { %8149 = vmatprep.subr.bf16.mxu0 %v9054_v56 }
 0xa9d   :  { %v3318_v15 = vpop.f32.mrb[6].mxu0 }
 0xa9e   :  { %v3324_v58 = vrot.slane %v3318_v15, 2  ;;  %v3320_v20 = vpop.f32.mrb[7].mxu0 }
 0xa9f   :  { %v3354_v8 = vadd.f32 %v3320_v20, %v9382_v53 }
 0xaa0   :  { %v3326_v5 = vadd.f32 %v9314_v59, %v3324_v58 }
 0xaa1   :  { %8694 = vtanh.f32 %v3354_v8  ;;  %v7456_v31 = vmul.f32 -1.442695, %v3354_v8 }
 0xaa2   :  { %8696 = vtanh.f32 %v3326_v5  ;;  %v7455_v29 = vmul.f32 -1.442695, %v3326_v5 }
 0xaa3   :  { %8698 = vpow2.f32 %v7456_v31 }
 0xaa4   :  { %8700 = vpow2.f32 %v7455_v29 }
 0xaab   :  { %v8695_v60 = vpop.eup %8694 }
 0xaac   :  { %v8697_v26 = vpop.eup %8696  ;;  %3364 = vrot.lane.b32.xlu0 %v8695_v60, %s8811_s0 }
 0xaad   :  { %3339 = vrot.lane.b32.xlu1 %v8697_v26, %s8811_s0  ;;  %v8699_v44 = vpop.eup %8698 }
 0xaae   :  { %v8701_v28 = vpop.eup %8700  ;;  %v3358_v48 = vadd.f32 1.0, %v8699_v44 }
 0xaaf   :  { %v3330_v46 = vadd.f32 1.0, %v8701_v28 }
 0xab0   :  { %8702 = vrcp.f32 %v3358_v48 }
 0xab1   :  { %8704 = vrcp.f32 %v3330_v46 }
 0xaba   :  { %v8703_v17 = vpop.eup %8702 }
 0xabb   :  { %v8705_v55 = vpop.eup %8704  ;;  %v3362_v32 = vmul.f32 %v8703_v17, %v9467_v12 }
 0xabc   :  { %v3337_v63 = vmul.f32 %v8705_v55, %v3335_v25 }
 0xb1e   :  { %v3365_v59 = vpop.permute.xlu0 %3364 }
 0xb1f   :  { %v3367_v62 = vmul.f32 %v8703_v17, %v3365_v59  ;;  %v3340_v33 = vpop.permute.xlu1 %3339 }
 0xb20   :  { %v3342_v37 = vmul.f32 %v8705_v55, %v3340_v33 }
 0xb21   :  { %3369 = vrot.lane.b32.xlu0 %v3367_v62, %s8813_s29 }
 0xb22   :  { %3344 = vrot.lane.b32.xlu1 %v3342_v37, %s8813_s29 }
 0xb93   :  { %v3370_v2 = vpop.permute.xlu0 %3369 }
 0xb94   :  { %v9541_v22 = vadd.f32 %v3370_v2, %v3362_v32  ;;  %v3345_v18 = vpop.permute.xlu1 %3344 }
 0xb95   :  { %v9543_v10 = vadd.f32 %v3345_v18, %v3337_v63 }
 0xb96   :  { %8706 = vtanh.f32 %v9541_v22 }
 0xb97   :  { %8708 = vtanh.f32 %v9543_v10 }
 0xba0   :  { %v8707_v61 = vpop.eup %8706 }
 0xba1   :  { %v8709_v15 = vpop.eup %8708  ;;  %3375 = vrot.lane.b32.xlu0 %v8707_v61, %s8811_s0 }
 0xba2   :  { %3350 = vrot.lane.b32.xlu1 %v8709_v15, %s8811_s0 }
 0xc13   :  { %v3376_v41 = vpop.permute.xlu0 %3375 }
 0xc14   :  { %v3378_v58 = vmul.f32 %v8703_v17, %v3376_v41  ;;  %v3351_v12 = vpop.permute.xlu1 %3350 }
 0xc15   :  { %v3353_v20 = vmul.f32 %v8705_v55, %v3351_v12 }
 0xc16   :  { %v3384_v8 = vrot.slane %v3378_v58, 2 }
 0xc17   :  { %3380 = vrot.lane.b32.xlu0 %v3353_v20, %s8813_s29 }
 0xc18   :  { %3385 = vrot.lane.b32.xlu1 %v3384_v8, %s8811_s0 }
 0xc89   :  { %v3381_v5 = vpop.permute.xlu0 %3380 }
 0xc8a   :  { %v3386_v60 = vpop.permute.xlu1 %3385 }
 0xc8b   :  { %v3388_v26 = vsel %vm557_vm2, %v3381_v5, %v3386_v60  ;;  %v4049_v60 = vrot.slane %v9543_v10, 6 }
 0xc8c   :  { %v3390_v31 = vrot.slane %v3388_v26, 6 }
 0xc8e   :  { %v3391_v29 = vsel %vm558_vm1, %v3390_v31, 0 }
 0xc8f   :  { %v3474_v44 = vand.u32 4294901760, %v3391_v29 }
 0xc91   :  { %v3475_v28 = vsub.f32 %v3391_v29, %v3474_v44 }
 0xc93   :  { %v3476_v48 = vand.u32 4294901760, %v3475_v28 }
 0xc95   :  { %v3477_v46 = vsub.f32 %v3475_v28, %v3476_v48 }
 0xc97   :  { %v3478_v59 = vand.u32 4294901760, %v3477_v46 }
 0xc99   :  { %3479 = vmatmul.mubr.f32.vlgmr.msra.gmra.mrb[14].mxu1 %v3478_v59 }
 0xc9a   :  { %8055 = vmatpush1.bf16.msra.mxu1 %v9068_v36  ;;  %3629 = vmatprep.mubr.f32.mxu1 %v8810_v49 }
 0xc9b   :  { %8057 = vmatprep.subr.bf16.mxu1 %v9080_v39 }
 0xc9e   :  { %8059 = vmatpush1.bf16.msra.mxu1 %v9135_v0 }
 0xc9f   :  { %8061 = vmatprep.subr.bf16.mxu1 %v9152_v3 }
 0xca2   :  { %8063 = vmatpush1.bf16.msra.mxu1 %v9157_v47 }
 0xca3   :  { %8065 = vmatprep.subr.bf16.mxu1 %v9161_v54 }
 0xca6   :  { %8067 = vmatpush1.bf16.msra.mxu1 %v9165_v27 }
 0xca7   :  { %8069 = vmatprep.subr.bf16.mxu1 %v9170_v40 }
 0xca9   :  { %3631 = vmatmul.mubr.f32.vlgmr.msra.gmra.mrb[14].mxu1 %v3474_v44 }
 0xcaa   :  { %8071 = vmatpush1.bf16.msra.mxu1 %v9182_v13  ;;  %3733 = vmatprep.mubr.f32.mxu1 %v8810_v49 }
 0xcab   :  { %8073 = vmatprep.subr.bf16.mxu1 %v9189_v6 }
 0xcae   :  { %8075 = vmatpush1.bf16.msra.mxu1 %v9196_v9 }
 0xcaf   :  { %8077 = vmatprep.subr.bf16.mxu1 %v9208_v21 }
 0xcb2   :  { %8079 = vmatpush1.bf16.msra.mxu1 %v9220_v11 }
 0xcb3   :  { %8081 = vmatprep.subr.bf16.mxu1 %v9232_v24 }
 0xcb6   :  { %8083 = vmatpush1.bf16.msra.mxu1 %v9244_v50 }
 0xcb7   :  { %8085 = vmatprep.subr.bf16.mxu1 %v8882_v23 }
 0xcb9   :  { %3736 = vmatmul.mubr.f32.vlgmr.msra.gmra.mrb[14].mxu1 %v3475_v28 }
 0xcba   :  { %8087 = vmatpush1.bf16.msra.mxu1 %v8904_v34  ;;  %3822 = vmatprep.mubr.f32.mxu1 %v8810_v49 }
 0xcbb   :  { %8089 = vmatprep.subr.bf16.mxu1 %v8922_v43 }
 0xcbe   :  { %8091 = vmatpush1.bf16.msra.mxu1 %v8937_v52 }
 0xcbf   :  { %8093 = vmatprep.subr.bf16.mxu1 %v8952_v57 }
 0xcc2   :  { %8095 = vmatpush1.bf16.msra.mxu1 %v8968_v4 }
 0xcc3   :  { %8097 = vmatprep.subr.bf16.mxu1 %v8987_v38 }
 0xcc6   :  { %8099 = vmatpush1.bf16.msra.mxu1 %v8993_v7 }
 0xcc7   :  { %8101 = vmatprep.subr.bf16.mxu1 %v9176_v1 }
 0xcc9   :  { %3826 = vmatmul.mubr.f32.vlgmr.msra.gmra.mrb[14].mxu1 %v3476_v48 }
 0xcca   :  { %8103 = vmatpush1.bf16.msra.mxu1 %v9203_v19  ;;  %3944 = vmatprep.mubr.f32.mxu1 %v8810_v49 }
 0xccb   :  { %8105 = vmatprep.subr.bf16.mxu1 %v9214_v14 }
 0xcce   :  { %8107 = vmatpush1.bf16.msra.mxu1 %v9227_v42 }
 0xccf   :  { %8109 = vmatprep.subr.bf16.mxu1 %v9239_v16 }
 0xcd2   :  { %8111 = vmatpush1.bf16.msra.mxu1 %v9251_v51 }
 0xcd3   :  { %8113 = vmatprep.subr.bf16.mxu1 %v9259_v30 }
 0xcd6   :  { %8115 = vmatpush1.bf16.msra.mxu1 %v9267_v35 }
 0xcd7   :  { %8117 = vmatprep.subr.bf16.mxu1 %v8882_v23 }
 0xcd9   :  { %3946 = vmatmul.mubr.f32.vlgmr.msra.gmra.mrb[14].mxu1 %v3474_v44 }
 0xcda   :  { %8119 = vmatpush1.bf16.msra.mxu1 %v8904_v34  ;;  %4032 = vmatprep.mubr.f32.mxu1 %v8810_v49 }
 0xcdb   :  { %8121 = vmatprep.subr.bf16.mxu1 %v8922_v43 }
 0xcde   :  { %8123 = vmatpush1.bf16.msra.mxu1 %v8937_v52 }
 0xcdf   :  { %8125 = vmatprep.subr.bf16.mxu1 %v8952_v57 }
 0xce2   :  { %8127 = vmatpush1.bf16.msra.mxu1 %v8968_v4 }
 0xce3   :  { %8129 = vmatprep.subr.bf16.mxu1 %v8987_v38 }
 0xce6   :  { %8131 = vmatpush1.bf16.msra.mxu1 %v8993_v7 }
 0xce7   :  { %8229 = vmatprep.subr.bf16.mxu1 %v8882_v23 }
 0xce9   :  { %4034 = vmatmul.mubr.f32.vlgmr.msra.gmra.mrb[14].mxu1 %v3474_v44 }
 0xcea   :  { %8231 = vmatpush1.bf16.msra.mxu1 %v8904_v34  ;;  %4902 = vmatprep.mubr.f32.mxu1 %v8810_v49 }
 0xceb   :  { %8233 = vmatprep.subr.bf16.mxu1 %v8922_v43 }
 0xcee   :  { %8235 = vmatpush1.bf16.msra.mxu1 %v8937_v52 }
 0xcef   :  { %8237 = vmatprep.subr.bf16.mxu1 %v8952_v57 }
 0xcf2   :  { %8239 = vmatpush1.bf16.msra.mxu1 %v8968_v4 }
 0xcf3   :  { %8241 = vmatprep.subr.bf16.mxu1 %v8987_v38 }
 0xcf6   :  { %8243 = vmatpush1.bf16.msra.mxu1 %v8993_v7 }
 0xcf7   :  { %8245 = vmatprep.subr.bf16.mxu1 %v9054_v56 }
 0xdbc   :  { %v4035_v17 = vpop.f32.mrb[14].mxu1 }
 0xdbd   :  { %v4040_v55 = vadd.f32 %v9312_v45, %v4035_v17  ;;  %v4037_v62 = vpop.f32.mrb[15].mxu1 }
 0xdbe   :  { %v4068_v33 = vadd.f32 %v4037_v62, %v9382_v53 }
 0xdbf   :  { %8710 = vtanh.f32 %v4040_v55  ;;  %v7457_v32 = vmul.f32 -1.442695, %v4040_v55 }
 0xdc0   :  { %8712 = vtanh.f32 %v4068_v33  ;;  %v7458_v2 = vmul.f32 -1.442695, %v4068_v33 }
 0xdc1   :  { %8714 = vpow2.f32 %v7457_v32 }
 0xdc2   :  { %8716 = vpow2.f32 %v7458_v2 }
 0xdc9   :  { %v8711_v37 = vpop.eup %8710 }
 0xdca   :  { %v8713_v25 = vpop.eup %8712  ;;  %4053 = vrot.lane.b32.xlu0 %v8711_v37, %s8811_s0 }
 0xdcb   :  { %4078 = vrot.lane.b32.xlu1 %v8713_v25, %s8811_s0  ;;  %v8715_v63 = vpop.eup %8714 }
 0xdcc   :  { %v8717_v18 = vpop.eup %8716  ;;  %v4044_v61 = vadd.f32 1.0, %v8715_v63 }
 0xdcd   :  { %v4072_v15 = vadd.f32 1.0, %v8717_v18 }
 0xdce   :  { %8718 = vrcp.f32 %v4044_v61 }
 0xdcf   :  { %8720 = vrcp.f32 %v4072_v15 }
 0xdd8   :  { %v8719_v41 = vpop.eup %8718 }
 0xdd9   :  { %v8721_v12 = vpop.eup %8720  ;;  %v4051_v26 = vmul.f32 %v8719_v41, %v4049_v60 }
 0xdda   :  { %v4076_v29 = vmul.f32 %v8721_v12, %v9541_v22 }
 0xe3c   :  { %v4054_v58 = vpop.permute.xlu0 %4053 }
 0xe3d   :  { %v4056_v20 = vmul.f32 %v8719_v41, %v4054_v58  ;;  %v4079_v8 = vpop.permute.xlu1 %4078 }
 0xe3e   :  { %v4081_v5 = vmul.f32 %v8721_v12, %v4079_v8 }
 0xe3f   :  { %4058 = vrot.lane.b32.xlu0 %v4056_v20, %s8813_s29 }
 0xe40   :  { %4083 = vrot.lane.b32.xlu1 %v4081_v5, %s8813_s29 }
 0xeb1   :  { %v4059_v31 = vpop.permute.xlu0 %4058 }
 0xeb2   :  { %v9615_v44 = vadd.f32 %v4059_v31, %v4051_v26  ;;  %v4084_v28 = vpop.permute.xlu1 %4083 }
 0xeb3   :  { %v9617_v48 = vadd.f32 %v4084_v28, %v4076_v29 }
 0xeb4   :  { %8722 = vtanh.f32 %v9615_v44 }
 0xeb5   :  { %8724 = vtanh.f32 %v9617_v48 }
 0xebe   :  { %v8723_v46 = vpop.eup %8722 }
 0xebf   :  { %v8725_v59 = vpop.eup %8724  ;;  %4064 = vrot.lane.b32.xlu0 %v8723_v46, %s8811_s0 }
 0xec0   :  { %4089 = vrot.lane.b32.xlu1 %v8725_v59, %s8811_s0 }
 0xf31   :  { %v4065_v10 = vpop.permute.xlu0 %4064 }
 0xf32   :  { %v4067_v17 = vmul.f32 %v8719_v41, %v4065_v10  ;;  %v4090_v55 = vpop.permute.xlu1 %4089 }
 0xf33   :  { %v4092_v62 = vmul.f32 %v8721_v12, %v4090_v55 }
 0xf34   :  { %4094 = vrot.lane.b32.xlu0 %v4067_v17, %s8813_s29 }
 0xf35   :  { %4098 = vrot.lane.b32.xlu1 %v4092_v62, %s8811_s0 }
 0xfa6   :  { %v4095_v22 = vpop.permute.xlu0 %4094 }
 0xfa7   :  { %v4099_v33 = vpop.permute.xlu1 %4098 }
 0xfa8   :  { %v4101_v37 = vsel %vm557_vm2, %v4095_v22, %v4099_v33  ;;  %v4764_v22 = vrot.slane %v9615_v44, 6 }
 0xfa9   :  { %v4103_v25 = vsel %vm558_vm1, %v4101_v37, 0 }
 0xfaa   :  { %v4186_v32 = vand.u32 4294901760, %v4103_v25 }
 0xfac   :  { %v4187_v2 = vsub.f32 %v4103_v25, %v4186_v32 }
 0xfae   :  { %v4188_v63 = vand.u32 4294901760, %v4187_v2 }
 0xfb0   :  { %v4189_v18 = vsub.f32 %v4187_v2, %v4188_v63 }
 0xfb2   :  { %v4190_v61 = vand.u32 4294901760, %v4189_v18 }
 0xfb4   :  { %4191 = vmatmul.mubr.f32.vlgmr.msra.gmra.mrb[8].mxu0 %v4190_v61 }
 0xfb5   :  { %8151 = vmatpush1.bf16.msra.mxu0 %v9068_v36  ;;  %4341 = vmatprep.mubr.f32.mxu0 %v8810_v49 }
 0xfb6   :  { %8153 = vmatprep.subr.bf16.mxu0 %v9080_v39 }
 0xfb9   :  { %8155 = vmatpush1.bf16.msra.mxu0 %v9135_v0 }
 0xfba   :  { %8157 = vmatprep.subr.bf16.mxu0 %v9152_v3 }
 0xfbd   :  { %8159 = vmatpush1.bf16.msra.mxu0 %v9157_v47 }
 0xfbe   :  { %8161 = vmatprep.subr.bf16.mxu0 %v9161_v54 }
 0xfc1   :  { %8163 = vmatpush1.bf16.msra.mxu0 %v9165_v27 }
 0xfc2   :  { %8165 = vmatprep.subr.bf16.mxu0 %v9170_v40 }
 0xfc4   :  { %4343 = vmatmul.mubr.f32.vlgmr.msra.gmra.mrb[8].mxu0 %v4186_v32 }
 0xfc5   :  { %8167 = vmatpush1.bf16.msra.mxu0 %v9182_v13  ;;  %4445 = vmatprep.mubr.f32.mxu0 %v8810_v49 }
 0xfc6   :  { %8169 = vmatprep.subr.bf16.mxu0 %v9189_v6 }
 0xfc9   :  { %8171 = vmatpush1.bf16.msra.mxu0 %v9196_v9 }
 0xfca   :  { %8173 = vmatprep.subr.bf16.mxu0 %v9208_v21 }
 0xfcd   :  { %8175 = vmatpush1.bf16.msra.mxu0 %v9220_v11 }
 0xfce   :  { %8177 = vmatprep.subr.bf16.mxu0 %v9232_v24 }
 0xfd1   :  { %8179 = vmatpush1.bf16.msra.mxu0 %v9244_v50 }
 0xfd2   :  { %8181 = vmatprep.subr.bf16.mxu0 %v8882_v23 }
 0xfd4   :  { %4448 = vmatmul.mubr.f32.vlgmr.msra.gmra.mrb[8].mxu0 %v4187_v2 }
 0xfd5   :  { %8183 = vmatpush1.bf16.msra.mxu0 %v8904_v34  ;;  %4534 = vmatprep.mubr.f32.mxu0 %v8810_v49 }
 0xfd6   :  { %8185 = vmatprep.subr.bf16.mxu0 %v8922_v43 }
 0xfd9   :  { %8187 = vmatpush1.bf16.msra.mxu0 %v8937_v52 }
 0xfda   :  { %8189 = vmatprep.subr.bf16.mxu0 %v8952_v57 }
 0xfdd   :  { %8191 = vmatpush1.bf16.msra.mxu0 %v8968_v4 }
 0xfde   :  { %8193 = vmatprep.subr.bf16.mxu0 %v8987_v38 }
 0xfe1   :  { %8195 = vmatpush1.bf16.msra.mxu0 %v8993_v7 }
 0xfe2   :  { %8197 = vmatprep.subr.bf16.mxu0 %v9176_v1 }
 0xfe4   :  { %4538 = vmatmul.mubr.f32.vlgmr.msra.gmra.mrb[8].mxu0 %v4188_v63 }
 0xfe5   :  { %8199 = vmatpush1.bf16.msra.mxu0 %v9203_v19  ;;  %4656 = vmatprep.mubr.f32.mxu0 %v8810_v49 }
 0xfe6   :  { %8201 = vmatprep.subr.bf16.mxu0 %v9214_v14 }
 0xfe9   :  { %8203 = vmatpush1.bf16.msra.mxu0 %v9227_v42 }
 0xfea   :  { %8205 = vmatprep.subr.bf16.mxu0 %v9239_v16 }
 0xfed   :  { %8207 = vmatpush1.bf16.msra.mxu0 %v9251_v51 }
 0xfee   :  { %8209 = vmatprep.subr.bf16.mxu0 %v9259_v30 }
 0xff1   :  { %8211 = vmatpush1.bf16.msra.mxu0 %v9267_v35 }
 0xff2   :  { %8213 = vmatprep.subr.bf16.mxu0 %v8882_v23 }
 0xff4   :  { %4658 = vmatmul.mubr.f32.vlgmr.msra.gmra.mrb[8].mxu0 %v4186_v32 }
 0xff5   :  { %8215 = vmatpush1.bf16.msra.mxu0 %v8904_v34  ;;  %4744 = vmatprep.mubr.f32.mxu0 %v8810_v49 }
 0xff6   :  { %8217 = vmatprep.subr.bf16.mxu0 %v8922_v43 }
 0xff9   :  { %8219 = vmatpush1.bf16.msra.mxu0 %v8937_v52 }
 0xffa   :  { %8221 = vmatprep.subr.bf16.mxu0 %v8952_v57 }
 0xffd   :  { %8223 = vmatpush1.bf16.msra.mxu0 %v8968_v4 }
 0xffe   :  { %8225 = vmatprep.subr.bf16.mxu0 %v8987_v38 }
0x1001   :  { %8227 = vmatpush1.bf16.msra.mxu0 %v8993_v7 }
0x1002   :  { %8325 = vmatprep.subr.bf16.mxu0 %v8882_v23 }
0x1004   :  { %4746 = vmatmul.mubr.f32.vlgmr.msra.gmra.mrb[8].mxu0 %v4186_v32 }
0x1005   :  { %8327 = vmatpush1.bf16.msra.mxu0 %v8904_v34  ;;  %5619 = vmatprep.mubr.f32.mxu0 %v8810_v49 }
0x1006   :  { %8329 = vmatprep.subr.bf16.mxu0 %v8922_v43 }
0x1009   :  { %8331 = vmatpush1.bf16.msra.mxu0 %v8937_v52 }
0x100a   :  { %8333 = vmatprep.subr.bf16.mxu0 %v8952_v57 }
0x100d   :  { %8335 = vmatpush1.bf16.msra.mxu0 %v8968_v4 }
0x100e   :  { %8337 = vmatprep.subr.bf16.mxu0 %v8987_v38 }
0x1011   :  { %8339 = vmatpush1.bf16.msra.mxu0 %v8993_v7 }
0x1012   :  { %8341 = vmatprep.subr.bf16.mxu0 %v9054_v56 }
0x10d7   :  { %v4747_v15 = vpop.f32.mrb[8].mxu0 }
0x10d8   :  { %v4753_v41 = vrot.slane %v4747_v15, 6  ;;  %v4749_v58 = vpop.f32.mrb[9].mxu0 }
0x10d9   :  { %v4783_v12 = vadd.f32 %v4749_v58, %v9382_v53 }
0x10da   :  { %v4755_v20 = vadd.f32 %v9312_v45, %v4753_v41 }
0x10db   :  { %8726 = vtanh.f32 %v4783_v12  ;;  %v7460_v60 = vmul.f32 -1.442695, %v4783_v12 }
0x10dc   :  { %8728 = vtanh.f32 %v4755_v20  ;;  %v7459_v26 = vmul.f32 -1.442695, %v4755_v20 }
0x10dd   :  { %8730 = vpow2.f32 %v7460_v60 }
0x10de   :  { %8732 = vpow2.f32 %v7459_v26 }
0x10e5   :  { %v8727_v8 = vpop.eup %8726 }
0x10e6   :  { %v8729_v5 = vpop.eup %8728  ;;  %4793 = vrot.lane.b32.xlu0 %v8727_v8, %s8811_s0 }
0x10e7   :  { %4768 = vrot.lane.b32.xlu1 %v8729_v5, %s8811_s0  ;;  %v8731_v31 = vpop.eup %8730 }
0x10e8   :  { %v8733_v29 = vpop.eup %8732  ;;  %v4787_v28 = vadd.f32 1.0, %v8731_v31 }
0x10e9   :  { %v4759_v46 = vadd.f32 1.0, %v8733_v29 }
0x10ea   :  { %8734 = vrcp.f32 %v4787_v28 }
0x10eb   :  { %8736 = vrcp.f32 %v4759_v46 }
0x10f4   :  { %v8735_v53 = vpop.eup %8734 }
0x10f5   :  { %v8737_v10 = vpop.eup %8736  ;;  %v4791_v33 = vmul.f32 %v8735_v53, %v9617_v48 }
0x10f6   :  { %v4766_v25 = vmul.f32 %v8737_v10, %v4764_v22 }
0x1158   :  { %v4794_v59 = vpop.permute.xlu0 %4793 }
0x1159   :  { %v4796_v17 = vmul.f32 %v8735_v53, %v4794_v59  ;;  %v4769_v55 = vpop.permute.xlu1 %4768 }
0x115a   :  { %v4771_v62 = vmul.f32 %v8737_v10, %v4769_v55 }
0x115b   :  { %4798 = vrot.lane.b32.xlu0 %v4796_v17, %s8813_s29  ;;  %v9755_v17 = vld [vmem:[#allocation2 + $0xa8] ss:$0 sm:$0xff] }
0x115c   :  { %4773 = vrot.lane.b32.xlu1 %v4771_v62, %s8813_s29 }
0x11cd   :  { %v4799_v37 = vpop.permute.xlu0 %4798 }
0x11ce   :  { %v9689_v32 = vadd.f32 %v4799_v37, %v4791_v33  ;;  %v4774_v2 = vpop.permute.xlu1 %4773 }
0x11cf   :  { %v9691_v63 = vadd.f32 %v4774_v2, %v4766_v25 }
0x11d0   :  { %8738 = vtanh.f32 %v9689_v32 }
0x11d1   :  { %8740 = vtanh.f32 %v9691_v63 }
0x11da   :  { %v8739_v18 = vpop.eup %8738 }
0x11db   :  { %v8741_v61 = vpop.eup %8740  ;;  %4804 = vrot.lane.b32.xlu0 %v8739_v18, %s8811_s0 }
0x11dc   :  { %4779 = vrot.lane.b32.xlu1 %v8741_v61, %s8811_s0 }
0x124d   :  { %v4805_v44 = vpop.permute.xlu0 %4804 }
0x124e   :  { %v4807_v15 = vmul.f32 %v8735_v53, %v4805_v44  ;;  %v4780_v48 = vpop.permute.xlu1 %4779 }
0x124f   :  { %v4782_v41 = vmul.f32 %v8737_v10, %v4780_v48 }
0x1250   :  { %v4813_v58 = vrot.slane %v4807_v15, 6 }
0x1251   :  { %4809 = vrot.lane.b32.xlu0 %v4782_v41, %s8813_s29 }
0x1252   :  { %4814 = vrot.lane.b32.xlu1 %v4813_v58, %s8811_s0 }
0x12c3   :  { %v4810_v12 = vpop.permute.xlu0 %4809 }
0x12c4   :  { %v4815_v20 = vpop.permute.xlu1 %4814 }
0x12c5   :  { %v4817_v8 = vsel %vm557_vm2, %v4810_v12, %v4815_v20  ;;  %v5481_v20 = vrot.slane %v9691_v63, 6 }
0x12c6   :  { %v4819_v5 = vrot.slane %v4817_v8, 2 }
0x12c8   :  { %v4820_v60 = vsel %vm558_vm1, %v4819_v5, 0 }
0x12c9   :  { %v4903_v26 = vand.u32 4294901760, %v4820_v60 }
0x12cb   :  { %v4904_v31 = vsub.f32 %v4820_v60, %v4903_v26 }
0x12cd   :  { %v4905_v29 = vand.u32 4294901760, %v4904_v31 }
0x12cf   :  { %v4906_v28 = vsub.f32 %v4904_v31, %v4905_v29 }
0x12d1   :  { %v4907_v46 = vand.u32 4294901760, %v4906_v28 }
0x12d3   :  { %4908 = vmatmul.mubr.f32.vlgmr.msra.gmra.mrb[16].mxu1 %v4907_v46 }
0x12d4   :  { %8247 = vmatpush1.bf16.msra.mxu1 %v9068_v36  ;;  %5058 = vmatprep.mubr.f32.mxu1 %v8810_v49 }
0x12d5   :  { %8249 = vmatprep.subr.bf16.mxu1 %v9080_v39 }
0x12d8   :  { %8251 = vmatpush1.bf16.msra.mxu1 %v9135_v0 }
0x12d9   :  { %8253 = vmatprep.subr.bf16.mxu1 %v9152_v3 }
0x12dc   :  { %8255 = vmatpush1.bf16.msra.mxu1 %v9157_v47 }
0x12dd   :  { %8257 = vmatprep.subr.bf16.mxu1 %v9161_v54 }
0x12e0   :  { %8259 = vmatpush1.bf16.msra.mxu1 %v9165_v27 }
0x12e1   :  { %8261 = vmatprep.subr.bf16.mxu1 %v9170_v40 }
0x12e3   :  { %5060 = vmatmul.mubr.f32.vlgmr.msra.gmra.mrb[16].mxu1 %v4903_v26 }
0x12e4   :  { %8263 = vmatpush1.bf16.msra.mxu1 %v9182_v13  ;;  %5162 = vmatprep.mubr.f32.mxu1 %v8810_v49 }
0x12e5   :  { %8265 = vmatprep.subr.bf16.mxu1 %v9189_v6 }
0x12e8   :  { %8267 = vmatpush1.bf16.msra.mxu1 %v9196_v9 }
0x12e9   :  { %8269 = vmatprep.subr.bf16.mxu1 %v9208_v21 }
0x12ec   :  { %8271 = vmatpush1.bf16.msra.mxu1 %v9220_v11 }
0x12ed   :  { %8273 = vmatprep.subr.bf16.mxu1 %v9232_v24 }
0x12f0   :  { %8275 = vmatpush1.bf16.msra.mxu1 %v9244_v50 }
0x12f1   :  { %8277 = vmatprep.subr.bf16.mxu1 %v8882_v23 }
0x12f3   :  { %5165 = vmatmul.mubr.f32.vlgmr.msra.gmra.mrb[16].mxu1 %v4904_v31 }
0x12f4   :  { %8279 = vmatpush1.bf16.msra.mxu1 %v8904_v34  ;;  %5251 = vmatprep.mubr.f32.mxu1 %v8810_v49 }
0x12f5   :  { %8281 = vmatprep.subr.bf16.mxu1 %v8922_v43 }
0x12f8   :  { %8283 = vmatpush1.bf16.msra.mxu1 %v8937_v52 }
0x12f9   :  { %8285 = vmatprep.subr.bf16.mxu1 %v8952_v57 }
0x12fc   :  { %8287 = vmatpush1.bf16.msra.mxu1 %v8968_v4 }
0x12fd   :  { %8289 = vmatprep.subr.bf16.mxu1 %v8987_v38 }
0x1300   :  { %8291 = vmatpush1.bf16.msra.mxu1 %v8993_v7 }
0x1301   :  { %8293 = vmatprep.subr.bf16.mxu1 %v9176_v1 }
0x1303   :  { %5255 = vmatmul.mubr.f32.vlgmr.msra.gmra.mrb[16].mxu1 %v4905_v29 }
0x1304   :  { %8295 = vmatpush1.bf16.msra.mxu1 %v9203_v19  ;;  %5373 = vmatprep.mubr.f32.mxu1 %v8810_v49 }
0x1305   :  { %8297 = vmatprep.subr.bf16.mxu1 %v9214_v14 }
0x1308   :  { %8299 = vmatpush1.bf16.msra.mxu1 %v9227_v42 }
0x1309   :  { %8301 = vmatprep.subr.bf16.mxu1 %v9239_v16 }
0x130c   :  { %8303 = vmatpush1.bf16.msra.mxu1 %v9251_v51 }
0x130d   :  { %8305 = vmatprep.subr.bf16.mxu1 %v9259_v30 }
0x1310   :  { %8307 = vmatpush1.bf16.msra.mxu1 %v9267_v35 }
0x1311   :  { %8309 = vmatprep.subr.bf16.mxu1 %v8882_v23 }
0x1313   :  { %5375 = vmatmul.mubr.f32.vlgmr.msra.gmra.mrb[16].mxu1 %v4903_v26 }
0x1314   :  { %8311 = vmatpush1.bf16.msra.mxu1 %v8904_v34  ;;  %5461 = vmatprep.mubr.f32.mxu1 %v8810_v49 }
0x1315   :  { %8313 = vmatprep.subr.bf16.mxu1 %v8922_v43 }
0x1318   :  { %8315 = vmatpush1.bf16.msra.mxu1 %v8937_v52 }
0x1319   :  { %8317 = vmatprep.subr.bf16.mxu1 %v8952_v57 }
0x131c   :  { %8319 = vmatpush1.bf16.msra.mxu1 %v8968_v4 }
0x131d   :  { %8321 = vmatprep.subr.bf16.mxu1 %v8987_v38 }
0x1320   :  { %8323 = vmatpush1.bf16.msra.mxu1 %v8993_v7 }
0x1321   :  { %8421 = vmatprep.subr.bf16.mxu1 %v8882_v23 }
0x1323   :  { %5463 = vmatmul.mubr.f32.vlgmr.msra.gmra.mrb[16].mxu1 %v4903_v26 }
0x1324   :  { %8423 = vmatpush1.bf16.msra.mxu1 %v8904_v34  ;;  %6336 = vmatprep.mubr.f32.mxu1 %v8810_v49 }
0x1325   :  { %8425 = vmatprep.subr.bf16.mxu1 %v8922_v43 }
0x1328   :  { %8427 = vmatpush1.bf16.msra.mxu1 %v8937_v52 }
0x1329   :  { %8429 = vmatprep.subr.bf16.mxu1 %v8952_v57 }
0x132c   :  { %8431 = vmatpush1.bf16.msra.mxu1 %v8968_v4 }
0x132d   :  { %8433 = vmatprep.subr.bf16.mxu1 %v8987_v38 }
0x1330   :  { %8435 = vmatpush1.bf16.msra.mxu1 %v8993_v7 }
0x1331   :  { %8437 = vmatprep.subr.bf16.mxu1 %v9054_v56 }
0x13f6   :  { %v5464_v53 = vpop.f32.mrb[16].mxu1 }
0x13f7   :  { %v5470_v59 = vrot.slane %v5464_v53, 4  ;;  %v5466_v10 = vpop.f32.mrb[17].mxu1 }
0x13f8   :  { %v5500_v55 = vadd.f32 %v9755_v17, %v5466_v10 }
0x13f9   :  { %v5472_v62 = vadd.f32 %v9312_v45, %v5470_v59 }
0x13fa   :  { %8742 = vtanh.f32 %v5500_v55  ;;  %v7462_v37 = vmul.f32 -1.442695, %v5500_v55 }
0x13fb   :  { %8744 = vtanh.f32 %v5472_v62  ;;  %v7461_v25 = vmul.f32 -1.442695, %v5472_v62 }
0x13fc   :  { %8746 = vpow2.f32 %v7462_v37 }
0x13fd   :  { %8748 = vpow2.f32 %v7461_v25 }
0x1404   :  { %v8743_v22 = vpop.eup %8742 }
0x1405   :  { %v8745_v33 = vpop.eup %8744  ;;  %5510 = vrot.lane.b32.xlu0 %v8743_v22, %s8811_s0 }
0x1406   :  { %5485 = vrot.lane.b32.xlu1 %v8745_v33, %s8811_s0  ;;  %v8747_v56 = vpop.eup %8746 }
0x1407   :  { %v8749_v2 = vpop.eup %8748  ;;  %v5504_v18 = vadd.f32 1.0, %v8747_v56 }
0x1408   :  { %v5476_v61 = vadd.f32 1.0, %v8749_v2 }
0x1409   :  { %8750 = vrcp.f32 %v5504_v18 }
0x140a   :  { %8752 = vrcp.f32 %v5476_v61 }
0x1413   :  { %v8751_v44 = vpop.eup %8750 }
0x1414   :  { %v8753_v48 = vpop.eup %8752  ;;  %v5508_v8 = vmul.f32 %v8751_v44, %v9689_v32 }
0x1415   :  { %v5483_v60 = vmul.f32 %v8753_v48, %v5481_v20 }
0x1477   :  { %v5511_v15 = vpop.permute.xlu0 %5510 }
0x1478   :  { %v5513_v41 = vmul.f32 %v8751_v44, %v5511_v15  ;;  %v5486_v58 = vpop.permute.xlu1 %5485 }
0x1479   :  { %v5488_v12 = vmul.f32 %v8753_v48, %v5486_v58 }
0x147a   :  { %5515 = vrot.lane.b32.xlu0 %v5513_v41, %s8813_s29 }
0x147b   :  { %5490 = vrot.lane.b32.xlu1 %v5488_v12, %s8813_s29 }
0x14ec   :  { %v5516_v5 = vpop.permute.xlu0 %5515 }
0x14ed   :  { %v9765_v26 = vadd.f32 %v5516_v5, %v5508_v8  ;;  %v5491_v31 = vpop.permute.xlu1 %5490 }
0x14ee   :  { %v9767_v29 = vadd.f32 %v5491_v31, %v5483_v60 }
0x14ef   :  { %8754 = vtanh.f32 %v9765_v26 }
0x14f0   :  { %8756 = vtanh.f32 %v9767_v29 }
0x14f9   :  { %v8755_v28 = vpop.eup %8754 }
0x14fa   :  { %v8757_v46 = vpop.eup %8756  ;;  %5521 = vrot.lane.b32.xlu0 %v8755_v28, %s8811_s0 }
0x14fb   :  { %5496 = vrot.lane.b32.xlu1 %v8757_v46, %s8811_s0 }
0x156c   :  { %v5522_v63 = vpop.permute.xlu0 %5521 }
0x156d   :  { %v5524_v53 = vmul.f32 %v8751_v44, %v5522_v63  ;;  %v5497_v32 = vpop.permute.xlu1 %5496 }
0x156e   :  { %v5499_v59 = vmul.f32 %v8753_v48, %v5497_v32 }
0x156f   :  { %v5530_v10 = vrot.slane %v5524_v53, 4 }
0x1570   :  { %5526 = vrot.lane.b32.xlu0 %v5499_v59, %s8813_s29 }
0x1571   :  { %5531 = vrot.lane.b32.xlu1 %v5530_v10, %s8811_s0 }
0x15e2   :  { %v5527_v55 = vpop.permute.xlu0 %5526 }
0x15e3   :  { %v5532_v62 = vpop.permute.xlu1 %5531 }
0x15e4   :  { %v5534_v22 = vsel %vm557_vm2, %v5527_v55, %v5532_v62  ;;  %v6198_v55 = vrot.slane %v9767_v29, 6 }
0x15e5   :  { %v5536_v33 = vrot.slane %v5534_v22, 4 }
0x15e7   :  { %v5537_v37 = vsel %vm558_vm1, %v5536_v33, 0 }
0x15e8   :  { %v5620_v25 = vand.u32 4294901760, %v5537_v37 }
0x15ea   :  { %v5621_v56 = vsub.f32 %v5537_v37, %v5620_v25 }
0x15ec   :  { %v5622_v2 = vand.u32 4294901760, %v5621_v56 }
0x15ee   :  { %v5623_v18 = vsub.f32 %v5621_v56, %v5622_v2 }
0x15f0   :  { %v5624_v61 = vand.u32 4294901760, %v5623_v18 }
0x15f2   :  { %5625 = vmatmul.mubr.f32.vlgmr.msra.gmra.mrb[10].mxu0 %v5624_v61 }
0x15f3   :  { %8343 = vmatpush1.bf16.msra.mxu0 %v9068_v36  ;;  %5775 = vmatprep.mubr.f32.mxu0 %v8810_v49 }
0x15f4   :  { %8345 = vmatprep.subr.bf16.mxu0 %v9080_v39 }
0x15f7   :  { %8347 = vmatpush1.bf16.msra.mxu0 %v9135_v0 }
0x15f8   :  { %8349 = vmatprep.subr.bf16.mxu0 %v9152_v3 }
0x15fb   :  { %8351 = vmatpush1.bf16.msra.mxu0 %v9157_v47 }
0x15fc   :  { %8353 = vmatprep.subr.bf16.mxu0 %v9161_v54 }
0x15ff   :  { %8355 = vmatpush1.bf16.msra.mxu0 %v9165_v27 }
0x1600   :  { %8357 = vmatprep.subr.bf16.mxu0 %v9170_v40 }
0x1602   :  { %5777 = vmatmul.mubr.f32.vlgmr.msra.gmra.mrb[10].mxu0 %v5620_v25 }
0x1603   :  { %8359 = vmatpush1.bf16.msra.mxu0 %v9182_v13  ;;  %5879 = vmatprep.mubr.f32.mxu0 %v8810_v49 }
0x1604   :  { %8361 = vmatprep.subr.bf16.mxu0 %v9189_v6 }
0x1607   :  { %8363 = vmatpush1.bf16.msra.mxu0 %v9196_v9 }
0x1608   :  { %8365 = vmatprep.subr.bf16.mxu0 %v9208_v21 }
0x160b   :  { %8367 = vmatpush1.bf16.msra.mxu0 %v9220_v11 }
0x160c   :  { %8369 = vmatprep.subr.bf16.mxu0 %v9232_v24 }
0x160f   :  { %8371 = vmatpush1.bf16.msra.mxu0 %v9244_v50 }
0x1610   :  { %8373 = vmatprep.subr.bf16.mxu0 %v8882_v23 }
0x1612   :  { %5882 = vmatmul.mubr.f32.vlgmr.msra.gmra.mrb[10].mxu0 %v5621_v56 }
0x1613   :  { %8375 = vmatpush1.bf16.msra.mxu0 %v8904_v34  ;;  %5968 = vmatprep.mubr.f32.mxu0 %v8810_v49 }
0x1614   :  { %8377 = vmatprep.subr.bf16.mxu0 %v8922_v43 }
0x1617   :  { %8379 = vmatpush1.bf16.msra.mxu0 %v8937_v52 }
0x1618   :  { %8381 = vmatprep.subr.bf16.mxu0 %v8952_v57 }
0x161b   :  { %8383 = vmatpush1.bf16.msra.mxu0 %v8968_v4 }
0x161c   :  { %8385 = vmatprep.subr.bf16.mxu0 %v8987_v38 }
0x161f   :  { %8387 = vmatpush1.bf16.msra.mxu0 %v8993_v7 }
0x1620   :  { %8389 = vmatprep.subr.bf16.mxu0 %v9176_v1 }
0x1622   :  { %5972 = vmatmul.mubr.f32.vlgmr.msra.gmra.mrb[10].mxu0 %v5622_v2 }
0x1623   :  { %8391 = vmatpush1.bf16.msra.mxu0 %v9203_v19  ;;  %6090 = vmatprep.mubr.f32.mxu0 %v8810_v49 }
0x1624   :  { %8393 = vmatprep.subr.bf16.mxu0 %v9214_v14 }
0x1627   :  { %8395 = vmatpush1.bf16.msra.mxu0 %v9227_v42 }
0x1628   :  { %8397 = vmatprep.subr.bf16.mxu0 %v9239_v16 }
0x162b   :  { %8399 = vmatpush1.bf16.msra.mxu0 %v9251_v51 }
0x162c   :  { %8401 = vmatprep.subr.bf16.mxu0 %v9259_v30 }
0x162f   :  { %8403 = vmatpush1.bf16.msra.mxu0 %v9267_v35 }
0x1630   :  { %8405 = vmatprep.subr.bf16.mxu0 %v8882_v23 }
0x1632   :  { %6092 = vmatmul.mubr.f32.vlgmr.msra.gmra.mrb[10].mxu0 %v5620_v25 }
0x1633   :  { %8407 = vmatpush1.bf16.msra.mxu0 %v8904_v34  ;;  %6178 = vmatprep.mubr.f32.mxu0 %v8810_v49 }
0x1634   :  { %8409 = vmatprep.subr.bf16.mxu0 %v8922_v43 }
0x1637   :  { %8411 = vmatpush1.bf16.msra.mxu0 %v8937_v52 }
0x1638   :  { %8413 = vmatprep.subr.bf16.mxu0 %v8952_v57 }
0x163b   :  { %8415 = vmatpush1.bf16.msra.mxu0 %v8968_v4 }
0x163c   :  { %8417 = vmatprep.subr.bf16.mxu0 %v8987_v38 }
0x163f   :  { %8419 = vmatpush1.bf16.msra.mxu0 %v8993_v7 }
0x1642   :  { %6180 = vmatmul.mubr.f32.vlgmr.msra.gmra.mrb[10].mxu0 %v5620_v25 }
0x1643   :  { %7570 = vmatprep.mubr.msk.f32.mxu0 %vm8815_vm3, %v8810_v49 }
0x1715   :  { %v6181_v44 = vpop.f32.mrb[10].mxu0 }
0x1716   :  { %v6187_v15 = vrot.slane %v6181_v44, 2  ;;  %v6183_v48 = vpop.f32.mrb[11].mxu0 }
0x1717   :  { %v6217_v41 = vadd.f32 %v9755_v17, %v6183_v48 }
0x1718   :  { %v6189_v58 = vadd.f32 %v9312_v45, %v6187_v15 }
0x1719   :  { %8758 = vtanh.f32 %v6217_v41  ;;  %v7464_v8 = vmul.f32 -1.442695, %v6217_v41 }
0x171a   :  { %8760 = vtanh.f32 %v6189_v58  ;;  %v7463_v5 = vmul.f32 -1.442695, %v6189_v58 }
0x171b   :  { %8762 = vpow2.f32 %v7464_v8 }
0x171c   :  { %8764 = vpow2.f32 %v7463_v5 }
0x1723   :  { %v8759_v12 = vpop.eup %8758 }
0x1724   :  { %v8761_v20 = vpop.eup %8760  ;;  %6227 = vrot.lane.b32.xlu0 %v8759_v12, %s8811_s0 }
0x1725   :  { %6202 = vrot.lane.b32.xlu1 %v8761_v20, %s8811_s0  ;;  %v8763_v60 = vpop.eup %8762 }
0x1726   :  { %v8765_v31 = vpop.eup %8764  ;;  %v6221_v28 = vadd.f32 1.0, %v8763_v60 }
0x1727   :  { %v6193_v46 = vadd.f32 1.0, %v8765_v31 }
0x1728   :  { %8766 = vrcp.f32 %v6221_v28 }
0x1729   :  { %8768 = vrcp.f32 %v6193_v46 }
0x1732   :  { %v8767_v63 = vpop.eup %8766 }
0x1733   :  { %v8769_v53 = vpop.eup %8768  ;;  %v6225_v62 = vmul.f32 %v8767_v63, %v9765_v26 }
0x1734   :  { %v6200_v33 = vmul.f32 %v8769_v53, %v6198_v55 }
0x1796   :  { %v6228_v45 = vpop.permute.xlu0 %6227 }
0x1797   :  { %v6230_v32 = vmul.f32 %v8767_v63, %v6228_v45  ;;  %v6203_v59 = vpop.permute.xlu1 %6202 }
0x1798   :  { %v6205_v10 = vmul.f32 %v8769_v53, %v6203_v59  ;;  %v6924_v59 = vld [vmem:[#allocation2 + $0xd0] sm:$0xff] }
0x1799   :  { %6232 = vrot.lane.b32.xlu0 %v6230_v32, %s8813_s29  ;;  %v8814_v32 = vmov 0.0|0.0   ;;  %v6939_v55 = vand.u32 4294901760, %v6924_v59 }
0x179a   :  { %6207 = vrot.lane.b32.xlu1 %v6205_v10, %s8813_s29  ;;  %8516 = vmatprep.subr.bf16.mxu0 %v8814_v32  ;;  %v6925_v10 = vld [vmem:[#allocation2 + $0xe0] sm:$0xff] }
0x180b   :  { %v6233_v22 = vpop.permute.xlu0 %6232 }
0x180c   :  { %v9829_v37 = vadd.f32 %v6233_v22, %v6225_v62  ;;  %v6208_v25 = vpop.permute.xlu1 %6207  ;;  %v6942_v62 = vand.u32 4294901760, %v6925_v10 }
0x180d   :  { %v9831_v56 = vadd.f32 %v6208_v25, %v6200_v33  ;;  %v7027_v25 = vsub.f32 %v6924_v59, %v6939_v55 }
0x180e   :  { %8770 = vtanh.f32 %v9829_v37 }
0x180f   :  { %8772 = vtanh.f32 %v9831_v56 }
0x1818   :  { %v8771_v2 = vpop.eup %8770 }
0x1819   :  { %v8773_v18 = vpop.eup %8772  ;;  %6238 = vrot.lane.b32.xlu0 %v8771_v2, %s8811_s0  ;;  %v7034_v2 = vsub.f32 %v6925_v10, %v6942_v62 }
0x181a   :  { %6213 = vrot.lane.b32.xlu1 %v8773_v18, %s8811_s0 }
0x188b   :  { %v6239_v29 = vpop.permute.xlu0 %6238 }
0x188c   :  { %v6241_v61 = vmul.f32 %v8767_v63, %v6239_v29  ;;  %v6214_v26 = vpop.permute.xlu1 %6213 }
0x188d   :  { %v6216_v44 = vmul.f32 %v8769_v53, %v6214_v26  ;;  %v7028_v26 = vand.u32 4294901760, %v7027_v25 }
0x188e   :  { %v6247_v15 = vrot.slane %v6241_v61, 2 }
0x188f   :  { %6243 = vrot.lane.b32.xlu0 %v6216_v44, %s8813_s29  ;;  %v7035_v44 = vand.u32 4294901760, %v7034_v2 }
0x1890   :  { %6248 = vrot.lane.b32.xlu1 %v6247_v15, %s8811_s0 }
0x1901   :  { %v9839_v48 = vpop.permute.xlu0 %6243 }
0x1902   :  { %v6249_v41 = vpop.permute.xlu1 %6248 }
0x1903   :  { %v6251_v58 = vsel %vm557_vm2, %v9839_v48, %v6249_v41 }
0x1904   :  { %v6253_v12 = vrot.slane %v6251_v58, 6  ;;  %v7029_v58 = vsub.f32 %v7027_v25, %v7028_v26 }
0x1906   :  { %v6254_v20 = vsel %vm558_vm1, %v6253_v12, 0  ;;  %v7036_v12 = vsub.f32 %v7034_v2, %v7035_v44 }
0x1907   :  { %v6337_v8 = vand.u32 4294901760, %v6254_v20 }
0x1909   :  { %v6338_v5 = vsub.f32 %v6254_v20, %v6337_v8 }
0x190b   :  { %v6339_v60 = vand.u32 4294901760, %v6338_v5 }
0x190d   :  { %v6340_v31 = vsub.f32 %v6338_v5, %v6339_v60 }
0x190f   :  { %v6341_v28 = vand.u32 4294901760, %v6340_v31 }
0x1911   :  { %6342 = vmatmul.mubr.f32.vlgmr.msra.gmra.mrb[18].mxu1 %v6341_v28 }
0x1912   :  { %8439 = vmatpush1.bf16.msra.mxu1 %v9068_v36  ;;  %6491 = vmatprep.mubr.f32.mxu1 %v8810_v49 }
0x1913   :  { %8441 = vmatprep.subr.bf16.mxu1 %v9080_v39 }
0x1916   :  { %8443 = vmatpush1.bf16.msra.mxu1 %v9135_v0 }
0x1917   :  { %8445 = vmatprep.subr.bf16.mxu1 %v9152_v3 }
0x191a   :  { %8447 = vmatpush1.bf16.msra.mxu1 %v9157_v47 }
0x191b   :  { %8449 = vmatprep.subr.bf16.mxu1 %v9161_v54 }
0x191e   :  { %8451 = vmatpush1.bf16.msra.mxu1 %v9165_v27 }
0x191f   :  { %8453 = vmatprep.subr.bf16.mxu1 %v9170_v40 }
0x1921   :  { %6493 = vmatmul.mubr.f32.vlgmr.msra.gmra.mrb[20].mxu1 %v6337_v8 }
0x1922   :  { %8455 = vmatpush1.bf16.msra.mxu1 %v9182_v13  ;;  %6594 = vmatprep.mubr.f32.mxu1 %v8810_v49 }
0x1923   :  { %8457 = vmatprep.subr.bf16.mxu1 %v9189_v6 }
0x1926   :  { %8459 = vmatpush1.bf16.msra.mxu1 %v9196_v9 }
0x1927   :  { %8461 = vmatprep.subr.bf16.mxu1 %v9208_v21 }
0x192a   :  { %8463 = vmatpush1.bf16.msra.mxu1 %v9220_v11 }
0x192b   :  { %8465 = vmatprep.subr.bf16.mxu1 %v9232_v24 }
0x192e   :  { %8467 = vmatpush1.bf16.msra.mxu1 %v9244_v50 }
0x192f   :  { %8469 = vmatprep.subr.bf16.mxu1 %v8882_v23 }
0x1931   :  { %6597 = vmatmul.mubr.f32.vlgmr.msra.gmra.mrb[22].mxu1 %v6338_v5  ;;  %v7030_v5 = vand.u32 4294901760, %v7029_v58 }
0x1932   :  { %8471 = vmatpush1.bf16.msra.mxu1 %v8904_v34  ;;  %6682 = vmatprep.mubr.f32.mxu1 %v8810_v49 }
0x1933   :  { %8473 = vmatprep.subr.bf16.mxu1 %v8922_v43 }
0x1936   :  { %8475 = vmatpush1.bf16.msra.mxu1 %v8937_v52 }
0x1937   :  { %8477 = vmatprep.subr.bf16.mxu1 %v8952_v57 }
0x193a   :  { %8479 = vmatpush1.bf16.msra.mxu1 %v8968_v4 }
0x193b   :  { %8481 = vmatprep.subr.bf16.mxu1 %v8987_v38 }
0x193e   :  { %8483 = vmatpush1.bf16.msra.mxu1 %v8993_v7 }
0x193f   :  { %8485 = vmatprep.subr.bf16.mxu1 %v9176_v1 }
0x1941   :  { %6686 = vmatmul.mubr.f32.vlgmr.msra.gmra.mrb[24].mxu1 %v6339_v60  ;;  %v7037_v60 = vand.u32 4294901760, %v7036_v12 }
0x1942   :  { %8487 = vmatpush1.bf16.msra.mxu1 %v9203_v19  ;;  %6803 = vmatprep.mubr.f32.mxu1 %v8810_v49 }
0x1943   :  { %8489 = vmatprep.subr.bf16.mxu1 %v9214_v14  ;;  %v8526_v28 = vpack.c.bf16 %v7037_v60, %v7030_v5 }
0x1946   :  { %8491 = vmatpush1.bf16.msra.mxu1 %v9227_v42 }
0x1947   :  { %8493 = vmatprep.subr.bf16.mxu1 %v9239_v16 }
0x194a   :  { %8495 = vmatpush1.bf16.msra.mxu1 %v9251_v51 }
0x194b   :  { %8497 = vmatprep.subr.bf16.mxu1 %v9259_v30  ;;  %v6922_v30 = vld [vmem:[#allocation2 + $0xb0] sm:$0xff] }
0x194e   :  { %8499 = vmatpush1.bf16.msra.mxu1 %v9267_v35  ;;  %v6923_v35 = vld [vmem:[#allocation2 + $0xc0] sm:$0xff] }
0x194f   :  { %8501 = vmatprep.subr.bf16.mxu1 %v8882_v23  ;;  %v6936_v46 = vand.u32 4294901760, %v6923_v35 }
0x1951   :  { %6805 = vmatmul.mubr.f32.vlgmr.msra.gmra.mrb[26].mxu1 %v6337_v8  ;;  %v7020_v53 = vsub.f32 %v6923_v35, %v6936_v46 }
0x1952   :  { %8503 = vmatpush1.bf16.msra.mxu1 %v8904_v34  ;;  %6890 = vmatprep.mubr.f32.mxu1 %v8810_v49 }
0x1953   :  { %8505 = vmatprep.subr.bf16.mxu1 %v8922_v43  ;;  %v7021_v33 = vand.u32 4294901760, %v7020_v53 }
0x1955   :  { %v7022_v29 = vsub.f32 %v7020_v53, %v7021_v33 }
0x1956   :  { %8507 = vmatpush1.bf16.msra.mxu1 %v8937_v52 }
0x1957   :  { %8509 = vmatprep.subr.bf16.mxu1 %v8952_v57  ;;  %v7023_v15 = vand.u32 4294901760, %v7022_v29 }
0x195a   :  { %8511 = vmatpush1.bf16.msra.mxu1 %v8968_v4 }
0x195b   :  { %8513 = vmatprep.subr.bf16.mxu1 %v8987_v38 }
0x195e   :  { %8515 = vmatpush1.bf16.msra.mxu1 %v8993_v7 }
0x1961   :  { %6892 = vmatmul.mubr.f32.vlgmr.msra.gmra.mrb[28].mxu1 %v6337_v8 }
0x19e4   :  { %v6343_v36 = vpop.f32.mrb[18].mxu1 }
0x19e5   :  { %v6344_v23 = vpop.f32.mrb[19].mxu1 }
0x19f4   :  { %v6494_v39 = vpop.f32.mrb[20].mxu1 }
0x19f5   :  { %v6495_v0 = vpop.f32.mrb[21].mxu1  ;;  %v8532_v39 = vpack.c.bf16 %v7034_v2, %v7027_v25 }
0x19f6   :  { %v6496_v34 = vadd.f32 %v6495_v0, %v6344_v23 }
0x1a04   :  { %v6598_v3 = vpop.f32.mrb[22].mxu1 }
0x1a05   :  { %v6599_v47 = vpop.f32.mrb[23].mxu1 }
0x1a06   :  { %v6600_v54 = vadd.f32 %v6599_v47, %v6496_v34  ;;  %v8544_v34 = vpack.c.bf16 %v7035_v44, %v7028_v26 }
0x1a14   :  { %v6687_v43 = vpop.f32.mrb[24].mxu1 }
0x1a15   :  { %v6688_v27 = vpop.f32.mrb[25].mxu1 }
0x1a16   :  { %v6689_v52 = vadd.f32 %v6688_v27, %v6600_v54 }
0x1a24   :  { %v6806_v40 = vpop.f32.mrb[26].mxu1 }
0x1a25   :  { %v6807_v57 = vpop.f32.mrb[27].mxu1 }
0x1a26   :  { %v6808_v1 = vadd.f32 %v6807_v57, %v6689_v52 }
0x1a34   :  { %v6893_v4 = vpop.f32.mrb[28].mxu1 }
0x1a35   :  { %v6894_v13 = vpop.f32.mrb[29].mxu1 }
0x1a36   :  { %v6895_v38 = vadd.f32 %v6894_v13, %v6808_v1 }
0x1a38   :  { %v6897_v7 = vadd.f32 %v9755_v17, %v6895_v38  ;;  %v6933_v17 = vand.u32 4294901760, %v6922_v30  ;;  %v6926_v38 = vld [vmem:[#allocation2 + $0xf0] ss:$0 sm:$0xff] }
0x1a3a   :  { %8774 = vtanh.f32 %v6897_v7  ;;  %v7465_v9 = vmul.f32 -1.442695, %v6897_v7  ;;  %v9893_v63 = vpack.c.bf16 %v6936_v46, %v6933_v17  ;;  %v7013_v45 = vsub.f32 %v6922_v30, %v6933_v17 }
0x1a3c   :  { %8776 = vpow2.f32 %v7465_v9  ;;  %8518 = vmatpush3.bf16.msra.mxu0 %v9893_v63  ;;  %v7014_v22 = vand.u32 4294901760, %v7013_v45  ;;  %v8529_v23 = vpack.c.bf16 %v7020_v53, %v7013_v45 }
0x1a3d   :  { %8519 = vmatprep.subr.bf16.mxu0 %v8814_v32 }
0x1a3e   :  { %v7015_v18 = vsub.f32 %v7013_v45, %v7014_v22  ;;  %v8541_v0 = vpack.c.bf16 %v7021_v33, %v7014_v22 }
0x1a40   :  { %v7016_v61 = vand.u32 4294901760, %v7015_v18 }
0x1a42   :  { %v8523_v8 = vpack.c.bf16 %v7023_v15, %v7016_v61 }
0x1a44   :  { %v8775_v6 = vpop.eup %8774 }
0x1a45   :  { %6907 = vrot.lane.b32.xlu0 %v8775_v6, %s8811_s0 }
0x1a46   :  { %v8777_v19 = vpop.eup %8776 }
0x1a47   :  { %v6901_v21 = vadd.f32 1.0, %v8777_v19 }
0x1a49   :  { %8778 = vrcp.f32 %v6901_v21 }
0x1a53   :  { %v8779_v14 = vpop.eup %8778 }
0x1a54   :  { %v6905_v24 = vmul.f32 %v8779_v14, %v9829_v37  ;;  %v9898_v37 = vpack.c.bf16 %v6942_v62, %v6939_v55 }
0x1a56   :  { %8521 = vmatpush3.bf16.msra.mxu0 %v9898_v37 }
0x1a57   :  { %8522 = vmatprep.subr.bf16.mxu0 %v8814_v32 }
0x1ab7   :  { %v6908_v11 = vpop.permute.xlu0 %6907 }
0x1ab8   :  { %v6910_v42 = vmul.f32 %v8779_v14, %v6908_v11 }
0x1aba   :  { %6912 = vrot.lane.b32.xlu1 %v6910_v42, %s8813_s29 }
0x1b2c   :  { %v6913_v16 = vpop.permute.xlu1 %6912 }
0x1b2d   :  { %v6915_v50 = vadd.f32 %v6913_v16, %v6905_v24 }
0x1b2f   :  { %8780 = vtanh.f32 %v6915_v50  ;;  %v7426_v36 = vrot.slane %v6915_v50, 2 }
0x1b39   :  { %v8781_v51 = vpop.eup %8780 }
0x1b3a   :  { %6918 = vrot.lane.b32.xlu0 %v8781_v51, %s8811_s0 }
0x1bac   :  { %v6919_v41 = vpop.permute.xlu0 %6918 }
0x1bad   :  { %v6921_v20 = vmul.f32 %v8779_v14, %v6919_v41 }
0x1baf   :  { %v7417_v31 = vrot.slane %v6921_v20, 2  ;;  %6928 = vrot.lane.b32.xlu1 %v6921_v20, %s8813_s29 }
0x1bb1   :  { %7418 = vrot.lane.b32.xlu0 %v7417_v31, %s8811_s0 }
0x1bb3   :  { %7422 = vrot.lane.b32.xlu1 %v9831_v56, %s8813_s29 }
0x1bb5   :  { %7427 = vrot.lane.b32.xlu0 %v7426_v36, %s8811_s0 }
0x1c21   :  { %v6929_v3 = vpop.permute.xlu1 %6928 }
0x1c22   :  { %v6930_v47 = vsel %vm557_vm2, %v6929_v3, 0 }
0x1c23   :  { %v7001_v54 = vand.u32 4294901760, %v6930_v47  ;;  %v7419_v56 = vpop.permute.xlu0 %7418 }
0x1c24   :  { %v7430_v57 = vsel %vm557_vm2, %v9839_v48, %v7419_v56 }
0x1c25   :  { %v7002_v43 = vsub.f32 %v6930_v47, %v7001_v54  ;;  %v7423_v1 = vpop.permute.xlu1 %7422 }
0x1c26   :  { %v7431_v4 = vsel %vm558_vm1, %v7430_v57, %v7423_v1 }
0x1c27   :  { %v7003_v27 = vand.u32 4294901760, %v7002_v43  ;;  %v7428_v13 = vpop.permute.xlu0 %7427 }
0x1c28   :  { %v7433_v7 = vsel %vm7432_vm4, %v7431_v4, %v7428_v13 }
0x1c29   :  { %v7004_v52 = vsub.f32 %v7002_v43, %v7003_v27 }
0x1c2b   :  { %v7005_v40 = vand.u32 4294901760, %v7004_v52 }
0x1c2d   :  { %7571 = vmatmul.mubr.f32.vlgmr.msra.gmra.mrb[12].mxu0 %v7005_v40 }
0x1c2e   :  { %8524 = vmatpush3.bf16.msra.mxu0 %v8523_v8  ;;  %7581 = vmatprep.mubr.msk.f32.mxu0 %vm8815_vm3, %v8810_v49 }
0x1c2f   :  { %8525 = vmatprep.subr.bf16.mxu0 %v8814_v32 }
0x1c32   :  { %8527 = vmatpush3.bf16.msra.mxu0 %v8526_v28 }
0x1c33   :  { %8528 = vmatprep.subr.bf16.mxu0 %v8814_v32 }
0x1c35   :  { %7582 = vmatmul.mubr.f32.vlgmr.msra.gmra.mrb[12].mxu0 %v7001_v54 }
0x1c36   :  { %8530 = vmatpush3.bf16.msra.mxu0 %v8529_v23  ;;  %7592 = vmatprep.mubr.msk.f32.mxu0 %vm8815_vm3, %v8810_v49 }
0x1c37   :  { %8531 = vmatprep.subr.bf16.mxu0 %v8814_v32 }
0x1c3a   :  { %8533 = vmatpush3.bf16.msra.mxu0 %v8532_v39 }
0x1c3b   :  { %8534 = vmatprep.subr.bf16.mxu0 %v8814_v32 }
0x1c3d   :  { %7593 = vmatmul.mubr.f32.vlgmr.msra.gmra.mrb[12].mxu0 %v7002_v43 }
0x1c3e   :  { %8536 = vmatpush3.bf16.msra.mxu0 %v9893_v63  ;;  %7603 = vmatprep.mubr.msk.f32.mxu0 %vm8815_vm3, %v8810_v49 }
0x1c3f   :  { %8537 = vmatprep.subr.bf16.mxu0 %v8814_v32 }
0x1c42   :  { %8539 = vmatpush3.bf16.msra.mxu0 %v9898_v37 }
0x1c43   :  { %8540 = vmatprep.subr.bf16.mxu0 %v8814_v32 }
0x1c45   :  { %7604 = vmatmul.mubr.f32.vlgmr.msra.gmra.mrb[12].mxu0 %v7003_v27 }
0x1c46   :  { %8542 = vmatpush3.bf16.msra.mxu0 %v8541_v0  ;;  %7614 = vmatprep.mubr.msk.f32.mxu0 %vm8815_vm3, %v8810_v49 }
0x1c47   :  { %8543 = vmatprep.subr.bf16.mxu0 %v8814_v32 }
0x1c4a   :  { %8545 = vmatpush3.bf16.msra.mxu0 %v8544_v34 }
0x1c4b   :  { %8546 = vmatprep.subr.bf16.mxu0 %v8814_v32 }
0x1c4d   :  { %7615 = vmatmul.mubr.f32.vlgmr.msra.gmra.mrb[12].mxu0 %v7001_v54 }
0x1c4e   :  { %8548 = vmatpush3.bf16.msra.mxu0 %v9893_v63  ;;  %7625 = vmatprep.mubr.msk.f32.mxu0 %vm8815_vm3, %v8810_v49  ;;  %v7435_v49 = vrot.slane %v7433_v7, 6 }
0x1c4f   :  { %8549 = vmatprep.subr.bf16.mxu0 %v8814_v32 }
0x1c52   :  { %8551 = vmatpush3.bf16.msra.mxu0 %v9898_v37 }
0x1c55   :  { %7626 = vmatmul.mubr.f32.vlgmr.msra.gmra.mrb[12].mxu0 %v7001_v54 }
0x1d28   :  { %v7413_v6 = vpop.f32.mrb[12].mxu0 }
0x1d29   :  { %v8556_v9 = vadd.f32 %v7413_v6, %v6926_v38  ;;  %v7627_v19 = vpop.f32.mrb[13].mxu0 }
0x1d2b   :  { %v7438_v21 = vrot.slane %v8556_v9, 6 }
0x1d2d   :  { %v7441_v14 = vsel %vm7440_vm5, %v7435_v49, %v7438_v21 }
0x1d2e   :  { %v7443_v11 = vsel %vm7442_vm6, %v7441_v14, 0.0 }
0x1d2f   :  { %7444 = vst [vmem:[%s9941_s2] sm:$0xff] %v7443_v11 }
0x1d30   :  { %7449 = vsyncpa [#allocation3], 1 }

</bundles_post_ra>
